<compile_context>
chip_gen: v6e
topology: v6e:2x2x1
jax: 0.10.0
libtpu: 0.0.40
codegen_flags: <defaults>
</compile_context>

<pallas_src>
import functools

import jax
import jax.numpy as jnp
import numpy as np
from jax.experimental import pallas as pl
from jax.experimental.pallas import tpu as pltpu

EPS = 1e-5  # nn.BatchNorm2d default


def _inv_basicblock_kernel(xf_ref, w1_ref, g1_ref, be1_ref,
                           w2_ref, g2_ref, be2_ref,
                           out_ref, p1_ref, p2_ref, *, H, W, C):
    # All refs use the lane-dense (channels, N*H*W) layout; pixel index
    # r = (n*H + y)*W + x lives on the 128-lane axis.
    Cin1, NHW = xf_ref.shape          # Cin1 = C + skip_channels
    Cmid = w1_ref.shape[0]
    xf = xf_ref[...]                  # (Cin1, NHW) f32 — cat([x, features])
    identity = xf[:C, :]              # residual branch (Cout == C assumed)

    # ---- pixel coordinates along the lane axis (SAME-padding masks), once ----
    r = jax.lax.broadcasted_iota(jnp.int32, (1, NHW), 1)
    if (W & (W - 1)) == 0 and (H & (H - 1)) == 0:    # power-of-two fast path
        xx = r & (W - 1)
        yy = (r >> (W.bit_length() - 1)) & (H - 1)
    else:
        xx = jax.lax.rem(r, W)
        yy = jax.lax.rem(jax.lax.div(r, W), H)

    masks = {}
    for dy in range(3):
        for dx in range(3):
            conds = []
            if dy == 0:
                conds.append(yy >= 1)
            if dy == 2:
                conds.append(yy <= H - 2)
            if dx == 0:
                conds.append(xx >= 1)
            if dx == 2:
                conds.append(xx <= W - 2)
            m = None
            for c in conds:
                m = c if m is None else (m & c)
            masks[(dy, dx)] = m                      # None => whole tap valid

    def write_taps(v, dst_ref, cn):
        # Column r of tap (dy, dx) holds v[:, r + (dy-1)*W + (dx-1)], zeroed
        # wherever the 3x3 window falls outside the HxW image (SAME padding).
        # Taps are stored directly into VMEM scratch at static, 8-row-aligned
        # offsets (no functional concatenate / extra copy pass).
        for t, (dy, dx) in enumerate((dy, dx) for dy in range(3) for dx in range(3)):
            s = (dy - 1) * W + (dx - 1)
            rolled = v if s == 0 else pltpu.roll(v, (-s) % NHW, axis=1)
            m = masks[(dy, dx)]
            tap = rolled if m is None else jnp.where(m, rolled, 0.0)
            dst_ref[pl.ds(t * cn, cn), :] = tap

    inv_n = jnp.float32(1.0 / NHW)

    # ---- conv1: single im2col MXU matmul, K = 9*Cin1 -------------------------
    write_taps(xf, p1_ref, Cin1)
    acc1 = jnp.dot(w1_ref[...], p1_ref[...],
                   preferred_element_type=jnp.float32)       # (Cmid, NHW) f32

    # conv1 bias omitted: it cancels exactly against the BN batch mean.
    # ---- bn1 folded to one scale + bias, ReLU fused ---------------------------
    m1 = jnp.sum(acc1, axis=1, keepdims=True) * inv_n
    v1 = jnp.sum(acc1 * acc1, axis=1, keepdims=True) * inv_n - m1 * m1
    a1 = g1_ref[...] * jax.lax.rsqrt(v1 + EPS)               # (Cmid, 1)
    c1 = be1_ref[...] - a1 * m1                               # (Cmid, 1)
    h1 = jnp.maximum(acc1 * a1 + c1, 0.0)

    # ---- conv2: single im2col MXU matmul, K = 9*Cmid --------------------------
    write_taps(h1, p2_ref, Cmid)
    acc2 = jnp.dot(w2_ref[...], p2_ref[...],
                   preferred_element_type=jnp.float32)       # (Cout, NHW) f32

    # ---- bn2 folded to one scale + bias ---------------------------------------
    m2 = jnp.sum(acc2, axis=1, keepdims=True) * inv_n
    v2 = jnp.sum(acc2 * acc2, axis=1, keepdims=True) * inv_n - m2 * m2
    a2 = g2_ref[...] * jax.lax.rsqrt(v2 + EPS)
    c2 = be2_ref[...] - a2 * m2

    # ---- residual add + relu; lane-dense unmasked full-lane store -------------
    out_ref[...] = jnp.maximum(acc2 * a2 + c2 + identity, 0.0)


def inv_basicblock_forward(x_nchw, feats_nchw, params):
    """x_nchw: (N, C, H, W); feats_nchw: (N, skip, H, W). Returns (N, C, H, W)."""
    (w1, b1, g1, be1, w2, b2, g2, be2) = params
    del b1, b2  # conv biases cancel against the training-mode BN batch mean
    N, C, H, W = x_nchw.shape
    S = feats_nchw.shape[1]
    NHW = N * H * W
    Cin1 = C + S
    Cmid = w1.shape[2]
    Cout = w2.shape[2]          # == C in the identity-passthrough configuration

    # channel concat + layout change done wrapper-side (fuses into one XLA op):
    # channels on sublanes, fused N*H*W pixels on lanes.
    xf = jnp.concatenate([x_nchw, feats_nchw], axis=1)               # (N, C+S, H, W)
    xf_t = jnp.transpose(xf, (1, 0, 2, 3)).reshape(Cin1, NHW).astype(jnp.float32)

    # weights (9, Cin, Cout) -> (Cout, 9*Cin) f32 for a single MXU matmul per conv.
    w1_t = jnp.transpose(w1.reshape(9 * Cin1, Cmid)).astype(jnp.float32)
    w2_t = jnp.transpose(w2.reshape(9 * Cmid, Cout)).astype(jnp.float32)
    g1c = g1.reshape(Cmid, 1).astype(jnp.float32)
    be1c = be1.reshape(Cmid, 1).astype(jnp.float32)
    g2c = g2.reshape(Cout, 1).astype(jnp.float32)
    be2c = be2.reshape(Cout, 1).astype(jnp.float32)

    vmem = pl.BlockSpec(memory_space=pltpu.MemorySpace.VMEM)
    out_t = pl.pallas_call(
        functools.partial(_inv_basicblock_kernel, H=H, W=W, C=C),
        out_shape=jax.ShapeDtypeStruct((Cout, NHW), jnp.float32),
        in_specs=[vmem] * 7,
        out_specs=vmem,
        scratch_shapes=[
            pltpu.VMEM((9 * Cin1, NHW), jnp.float32),   # conv1 im2col patch matrix
            pltpu.VMEM((9 * Cmid, NHW), jnp.float32),   # conv2 im2col patch matrix
        ],
    )(xf_t, w1_t, g1c, be1c, w2_t, g2c, be2c)

    # (Cout, N*H*W) -> (N, Cout, H, W); reshape free, one boundary transpose.
    return jnp.transpose(out_t.reshape(Cout, N, H, W), (1, 0, 2, 3))


# ----------------------- pure-JAX reference (for checking) -----------------------
def _conv3x3_ref(x_nhwc, w9):
    w_hwio = w9.reshape(3, 3, w9.shape[1], w9.shape[2])
    return jax.lax.conv_general_dilated(
        x_nhwc, w_hwio, window_strides=(1, 1), padding="SAME",
        dimension_numbers=("NHWC", "HWIO", "NHWC"))


def _bn_train_ref(x, g, b):
    m = jnp.mean(x, axis=(0, 1, 2))
    v = jnp.mean((x - m) ** 2, axis=(0, 1, 2))
    return (x - m) * jax.lax.rsqrt(v + EPS) * g.reshape(-1) + b.reshape(-1)


def ref_forward(x_nchw, feats_nchw, params):
    (w1, b1, g1, be1, w2, b2, g2, be2) = params
    x = jnp.transpose(x_nchw, (0, 2, 3, 1)).astype(jnp.float32)
    f = jnp.transpose(feats_nchw, (0, 2, 3, 1)).astype(jnp.float32)
    xcat = jnp.concatenate([x, f], axis=-1)
    o = _conv3x3_ref(xcat, w1) + b1.reshape(-1)      # bias kept here on purpose
    o = jnp.maximum(_bn_train_ref(o, g1, be1), 0.0)
    o = _conv3x3_ref(o, w2) + b2.reshape(-1)
    o = _bn_train_ref(o, g2, be2)
    o = jnp.maximum(o + x, 0.0)
    return jnp.transpose(o, (0, 3, 1, 2))


if __name__ == "__main__":
    # Configuration: planes = 8, skip_channels = 8, block.downsample = None
    #   -> conv1: (8+8)->8, conv2: 8->8, both 3x3 / stride 1 / pad 1.
    N, C, SKIP, H, W = 2, 8, 8, 16, 16
    Cin1 = C + SKIP

    key = jax.random.PRNGKey(0)
    ks = jax.random.split(key, 10)

    # Deterministic synthetic parameters (conv weights stored as (9, Cin, Cout)).
    w1 = jax.random.normal(ks[0], (9, Cin1, C), jnp.float32) * 0.1
    b1 = jax.random.normal(ks[1], (1, C), jnp.float32) * 0.1
    g1 = 1.0 + 0.1 * jax.random.normal(ks[2], (1, C), jnp.float32)
    be1 = 0.1 * jax.random.normal(ks[3], (1, C), jnp.float32)
    w2 = jax.random.normal(ks[4], (9, C, C), jnp.float32) * 0.1
    b2 = jax.random.normal(ks[5], (1, C), jnp.float32) * 0.1
    g2 = 1.0 + 0.1 * jax.random.normal(ks[6], (1, C), jnp.float32)
    be2 = 0.1 * jax.random.normal(ks[7], (1, C), jnp.float32)
    params = (w1, b1, g1, be1, w2, b2, g2, be2)

    x = jax.random.normal(ks[8], (N, C, H, W), jnp.float32)
    feats = jax.random.normal(ks[9], (N, SKIP, H, W), jnp.float32)

    out = jax.jit(inv_basicblock_forward)(x, feats, params)
    out = jax.block_until_ready(out)

    ref = jax.block_until_ready(ref_forward(x, feats, params))
    # f32 matmul with default MXU precision -> modest tolerance.
    np.testing.assert_allclose(np.asarray(out), np.asarray(ref),
                               rtol=2e-2, atol=2e-2)

    print("KERNEL_OK")
</pallas_src>

<mosaic_0001>
module attributes {stable_mosaic.version = 11 : i64} {
  func.func @_inv_basicblock_kernel(%arg0: memref<16x512xf32, #tpu.memory_space<vmem>>, %arg1: memref<8x144xf32, #tpu.memory_space<vmem>>, %arg2: memref<8x1xf32, #tpu.memory_space<vmem>>, %arg3: memref<8x1xf32, #tpu.memory_space<vmem>>, %arg4: memref<8x72xf32, #tpu.memory_space<vmem>>, %arg5: memref<8x1xf32, #tpu.memory_space<vmem>>, %arg6: memref<8x1xf32, #tpu.memory_space<vmem>>, %arg7: memref<8x512xf32, #tpu.memory_space<vmem>>, %arg8: memref<144x512xf32, #tpu.memory_space<vmem>>, %arg9: memref<72x512xf32, #tpu.memory_space<vmem>>) attributes {dimension_semantics = [], scalar_prefetch = 0 : i64, scratch_operands = 2 : i64, tpu.core_type = #tpu.core_type<tc>} {
    %c0 = arith.constant 0 : index
    %c0_0 = arith.constant 0 : index
    %0 = vector.load %arg0[%c0, %c0_0] : memref<16x512xf32, #tpu.memory_space<vmem>>, vector<16x512xf32>
    %1 = vector.extract_strided_slice %0 {offsets = [0, 0], sizes = [8, 512], strides = [1, 1]} : vector<16x512xf32> to vector<8x512xf32>
    %2 = tpu.iota {dimensions = array<i32: 1>} : vector<1x512xi32>
    %c15_i32 = arith.constant 15 : i32
    %3 = vector.broadcast %c15_i32 : i32 to vector<1x512xi32>
    %4 = arith.andi %2, %3 : vector<1x512xi32>
    %c4_i32 = arith.constant 4 : i32
    %5 = vector.broadcast %c4_i32 : i32 to vector<1x512xi32>
    %6 = arith.shrsi %2, %5 : vector<1x512xi32>
    %c15_i32_1 = arith.constant 15 : i32
    %7 = vector.broadcast %c15_i32_1 : i32 to vector<1x512xi32>
    %8 = arith.andi %6, %7 : vector<1x512xi32>
    %c1_i32 = arith.constant 1 : i32
    %9 = vector.broadcast %c1_i32 : i32 to vector<1x512xi32>
    %10 = arith.cmpi sge, %8, %9 : vector<1x512xi32>
    %c1_i32_2 = arith.constant 1 : i32
    %11 = vector.broadcast %c1_i32_2 : i32 to vector<1x512xi32>
    %12 = arith.cmpi sge, %4, %11 : vector<1x512xi32>
    %13 = arith.andi %10, %12 : vector<1x512xi1>
    %c1_i32_3 = arith.constant 1 : i32
    %14 = vector.broadcast %c1_i32_3 : i32 to vector<1x512xi32>
    %15 = arith.cmpi sge, %8, %14 : vector<1x512xi32>
    %c1_i32_4 = arith.constant 1 : i32
    %16 = vector.broadcast %c1_i32_4 : i32 to vector<1x512xi32>
    %17 = arith.cmpi sge, %8, %16 : vector<1x512xi32>
    %c14_i32 = arith.constant 14 : i32
    %18 = vector.broadcast %c14_i32 : i32 to vector<1x512xi32>
    %19 = arith.cmpi sle, %4, %18 : vector<1x512xi32>
    %20 = arith.andi %17, %19 : vector<1x512xi1>
    %c1_i32_5 = arith.constant 1 : i32
    %21 = vector.broadcast %c1_i32_5 : i32 to vector<1x512xi32>
    %22 = arith.cmpi sge, %4, %21 : vector<1x512xi32>
    %c14_i32_6 = arith.constant 14 : i32
    %23 = vector.broadcast %c14_i32_6 : i32 to vector<1x512xi32>
    %24 = arith.cmpi sle, %4, %23 : vector<1x512xi32>
    %c14_i32_7 = arith.constant 14 : i32
    %25 = vector.broadcast %c14_i32_7 : i32 to vector<1x512xi32>
    %26 = arith.cmpi sle, %8, %25 : vector<1x512xi32>
    %c1_i32_8 = arith.constant 1 : i32
    %27 = vector.broadcast %c1_i32_8 : i32 to vector<1x512xi32>
    %28 = arith.cmpi sge, %4, %27 : vector<1x512xi32>
    %29 = arith.andi %26, %28 : vector<1x512xi1>
    %c14_i32_9 = arith.constant 14 : i32
    %30 = vector.broadcast %c14_i32_9 : i32 to vector<1x512xi32>
    %31 = arith.cmpi sle, %8, %30 : vector<1x512xi32>
    %c14_i32_10 = arith.constant 14 : i32
    %32 = vector.broadcast %c14_i32_10 : i32 to vector<1x512xi32>
    %33 = arith.cmpi sle, %8, %32 : vector<1x512xi32>
    %c14_i32_11 = arith.constant 14 : i32
    %34 = vector.broadcast %c14_i32_11 : i32 to vector<1x512xi32>
    %35 = arith.cmpi sle, %4, %34 : vector<1x512xi32>
    %36 = arith.andi %33, %35 : vector<1x512xi1>
    %c17_i32 = arith.constant 17 : i32
    %37 = tpu.dynamic_rotate %0 by %c17_i32 dim 1 : vector<16x512xf32>, i32 -> vector<16x512xf32>
    %cst = arith.constant 0.000000e+00 : f32
    %38 = vector.shape_cast %13 : vector<1x512xi1> to vector<1x512xi1>
    %39 = vector.broadcast %38 : vector<1x512xi1> to vector<16x512xi1>
    %40 = vector.broadcast %cst : f32 to vector<16x512xf32>
    %41 = arith.select %39, %37, %40 : vector<16x512xi1>, vector<16x512xf32>
    %c0_12 = arith.constant 0 : index
    %c0_13 = arith.constant 0 : index
    %42 = vector.load %arg8[%c0_12, %c0_13] : memref<144x512xf32, #tpu.memory_space<vmem>>, vector<16x512xf32>
    tpu.vector_store %arg8[%c0_12, %c0_13], %41 {strides = array<i32>} : memref<144x512xf32, #tpu.memory_space<vmem>>, vector<16x512xf32>,
    %c16_i32 = arith.constant 16 : i32
    %43 = tpu.dynamic_rotate %0 by %c16_i32 dim 1 : vector<16x512xf32>, i32 -> vector<16x512xf32>
    %cst_14 = arith.constant 0.000000e+00 : f32
    %44 = vector.shape_cast %15 : vector<1x512xi1> to vector<1x512xi1>
    %45 = vector.broadcast %44 : vector<1x512xi1> to vector<16x512xi1>
    %46 = vector.broadcast %cst_14 : f32 to vector<16x512xf32>
    %47 = arith.select %45, %43, %46 : vector<16x512xi1>, vector<16x512xf32>
    %c16 = arith.constant 16 : index
    %c0_15 = arith.constant 0 : index
    %48 = vector.load %arg8[%c16, %c0_15] : memref<144x512xf32, #tpu.memory_space<vmem>>, vector<16x512xf32>
    tpu.vector_store %arg8[%c16, %c0_15], %47 {strides = array<i32>} : memref<144x512xf32, #tpu.memory_space<vmem>>, vector<16x512xf32>,
    %c15_i32_16 = arith.constant 15 : i32
    %49 = tpu.dynamic_rotate %0 by %c15_i32_16 dim 1 : vector<16x512xf32>, i32 -> vector<16x512xf32>
    %cst_17 = arith.constant 0.000000e+00 : f32
    %50 = vector.shape_cast %20 : vector<1x512xi1> to vector<1x512xi1>
    %51 = vector.broadcast %50 : vector<1x512xi1> to vector<16x512xi1>
    %52 = vector.broadcast %cst_17 : f32 to vector<16x512xf32>
    %53 = arith.select %51, %49, %52 : vector<16x512xi1>, vector<16x512xf32>
    %c32 = arith.constant 32 : index
    %c0_18 = arith.constant 0 : index
    %54 = vector.load %arg8[%c32, %c0_18] : memref<144x512xf32, #tpu.memory_space<vmem>>, vector<16x512xf32>
    tpu.vector_store %arg8[%c32, %c0_18], %53 {strides = array<i32>} : memref<144x512xf32, #tpu.memory_space<vmem>>, vector<16x512xf32>,
    %c1_i32_19 = arith.constant 1 : i32
    %55 = tpu.dynamic_rotate %0 by %c1_i32_19 dim 1 : vector<16x512xf32>, i32 -> vector<16x512xf32>
    %cst_20 = arith.constant 0.000000e+00 : f32
    %56 = vector.shape_cast %22 : vector<1x512xi1> to vector<1x512xi1>
    %57 = vector.broadcast %56 : vector<1x512xi1> to vector<16x512xi1>
    %58 = vector.broadcast %cst_20 : f32 to vector<16x512xf32>
    %59 = arith.select %57, %55, %58 : vector<16x512xi1>, vector<16x512xf32>
    %c48 = arith.constant 48 : index
    %c0_21 = arith.constant 0 : index
    %60 = vector.load %arg8[%c48, %c0_21] : memref<144x512xf32, #tpu.memory_space<vmem>>, vector<16x512xf32>
    tpu.vector_store %arg8[%c48, %c0_21], %59 {strides = array<i32>} : memref<144x512xf32, #tpu.memory_space<vmem>>, vector<16x512xf32>,
    %c64 = arith.constant 64 : index
    %c0_22 = arith.constant 0 : index
    %61 = vector.load %arg8[%c64, %c0_22] : memref<144x512xf32, #tpu.memory_space<vmem>>, vector<16x512xf32>
    tpu.vector_store %arg8[%c64, %c0_22], %0 {strides = array<i32>} : memref<144x512xf32, #tpu.memory_space<vmem>>, vector<16x512xf32>,
    %c511_i32 = arith.constant 511 : i32
    %62 = tpu.dynamic_rotate %0 by %c511_i32 dim 1 : vector<16x512xf32>, i32 -> vector<16x512xf32>
    %cst_23 = arith.constant 0.000000e+00 : f32
    %63 = vector.shape_cast %24 : vector<1x512xi1> to vector<1x512xi1>
    %64 = vector.broadcast %63 : vector<1x512xi1> to vector<16x512xi1>
    %65 = vector.broadcast %cst_23 : f32 to vector<16x512xf32>
    %66 = arith.select %64, %62, %65 : vector<16x512xi1>, vector<16x512xf32>
    %c80 = arith.constant 80 : index
    %c0_24 = arith.constant 0 : index
    %67 = vector.load %arg8[%c80, %c0_24] : memref<144x512xf32, #tpu.memory_space<vmem>>, vector<16x512xf32>
    tpu.vector_store %arg8[%c80, %c0_24], %66 {strides = array<i32>} : memref<144x512xf32, #tpu.memory_space<vmem>>, vector<16x512xf32>,
    %c497_i32 = arith.constant 497 : i32
    %68 = tpu.dynamic_rotate %0 by %c497_i32 dim 1 : vector<16x512xf32>, i32 -> vector<16x512xf32>
    %cst_25 = arith.constant 0.000000e+00 : f32
    %69 = vector.shape_cast %29 : vector<1x512xi1> to vector<1x512xi1>
    %70 = vector.broadcast %69 : vector<1x512xi1> to vector<16x512xi1>
    %71 = vector.broadcast %cst_25 : f32 to vector<16x512xf32>
    %72 = arith.select %70, %68, %71 : vector<16x512xi1>, vector<16x512xf32>
    %c96 = arith.constant 96 : index
    %c0_26 = arith.constant 0 : index
    %73 = vector.load %arg8[%c96, %c0_26] : memref<144x512xf32, #tpu.memory_space<vmem>>, vector<16x512xf32>
    tpu.vector_store %arg8[%c96, %c0_26], %72 {strides = array<i32>} : memref<144x512xf32, #tpu.memory_space<vmem>>, vector<16x512xf32>,
    %c496_i32 = arith.constant 496 : i32
    %74 = tpu.dynamic_rotate %0 by %c496_i32 dim 1 : vector<16x512xf32>, i32 -> vector<16x512xf32>
    %cst_27 = arith.constant 0.000000e+00 : f32
    %75 = vector.shape_cast %31 : vector<1x512xi1> to vector<1x512xi1>
    %76 = vector.broadcast %75 : vector<1x512xi1> to vector<16x512xi1>
    %77 = vector.broadcast %cst_27 : f32 to vector<16x512xf32>
    %78 = arith.select %76, %74, %77 : vector<16x512xi1>, vector<16x512xf32>
    %c112 = arith.constant 112 : index
    %c0_28 = arith.constant 0 : index
    %79 = vector.load %arg8[%c112, %c0_28] : memref<144x512xf32, #tpu.memory_space<vmem>>, vector<16x512xf32>
    tpu.vector_store %arg8[%c112, %c0_28], %78 {strides = array<i32>} : memref<144x512xf32, #tpu.memory_space<vmem>>, vector<16x512xf32>,
    %c495_i32 = arith.constant 495 : i32
    %80 = tpu.dynamic_rotate %0 by %c495_i32 dim 1 : vector<16x512xf32>, i32 -> vector<16x512xf32>
    %cst_29 = arith.constant 0.000000e+00 : f32
    %81 = vector.shape_cast %36 : vector<1x512xi1> to vector<1x512xi1>
    %82 = vector.broadcast %81 : vector<1x512xi1> to vector<16x512xi1>
    %83 = vector.broadcast %cst_29 : f32 to vector<16x512xf32>
    %84 = arith.select %82, %80, %83 : vector<16x512xi1>, vector<16x512xf32>
    %c128 = arith.constant 128 : index
    %c0_30 = arith.constant 0 : index
    %85 = vector.load %arg8[%c128, %c0_30] : memref<144x512xf32, #tpu.memory_space<vmem>>, vector<16x512xf32>
    tpu.vector_store %arg8[%c128, %c0_30], %84 {strides = array<i32>} : memref<144x512xf32, #tpu.memory_space<vmem>>, vector<16x512xf32>,
    %c0_31 = arith.constant 0 : index
    %c0_32 = arith.constant 0 : index
    %86 = vector.load %arg1[%c0_31, %c0_32] : memref<8x144xf32, #tpu.memory_space<vmem>>, vector<8x144xf32>
    %c0_33 = arith.constant 0 : index
    %c0_34 = arith.constant 0 : index
    %87 = vector.load %arg8[%c0_33, %c0_34] : memref<144x512xf32, #tpu.memory_space<vmem>>, vector<144x512xf32>
    %cst_35 = arith.constant dense<0.000000e+00> : vector<8x512xf32>
    %88 = tpu.matmul %86, %87, %cst_35 {dimension_numbers = #tpu.dot_dimension_numbers<[1], [0], [0], [1], [0, 0, 1, 1], [], []>} : vector<8x144xf32>, vector<144x512xf32>, vector<8x512xf32> -> vector<8x512xf32>
    %cst_36 = arith.constant dense<0.000000e+00> : vector<8xf32>
    %89 = vector.multi_reduction <add>, %88, %cst_36 [1] : vector<8x512xf32> to vector<8xf32>
    %90 = vector.shape_cast %89 : vector<8xf32> to vector<8x1xf32>
    %cst_37 = arith.constant 0.001953125 : f32
    %91 = vector.broadcast %cst_37 : f32 to vector<8x1xf32>
    %92 = arith.mulf %90, %91 : vector<8x1xf32>
    %93 = arith.mulf %88, %88 : vector<8x512xf32>
    %cst_38 = arith.constant dense<0.000000e+00> : vector<8xf32>
    %94 = vector.multi_reduction <add>, %93, %cst_38 [1] : vector<8x512xf32> to vector<8xf32>
    %95 = vector.shape_cast %94 : vector<8xf32> to vector<8x1xf32>
    %cst_39 = arith.constant 0.001953125 : f32
    %96 = vector.broadcast %cst_39 : f32 to vector<8x1xf32>
    %97 = arith.mulf %95, %96 : vector<8x1xf32>
    %98 = arith.mulf %92, %92 : vector<8x1xf32>
    %99 = arith.subf %97, %98 : vector<8x1xf32>
    %c0_40 = arith.constant 0 : index
    %c0_41 = arith.constant 0 : index
    %100 = vector.load %arg2[%c0_40, %c0_41] : memref<8x1xf32, #tpu.memory_space<vmem>>, vector<8x1xf32>
    %cst_42 = arith.constant 9.99999974E-6 : f32
    %101 = vector.broadcast %cst_42 : f32 to vector<8x1xf32>
    %102 = arith.addf %99, %101 : vector<8x1xf32>
    %103 = math.rsqrt %102 : vector<8x1xf32>
    %104 = arith.mulf %100, %103 : vector<8x1xf32>
    %c0_43 = arith.constant 0 : index
    %c0_44 = arith.constant 0 : index
    %105 = vector.load %arg3[%c0_43, %c0_44] : memref<8x1xf32, #tpu.memory_space<vmem>>, vector<8x1xf32>
    %106 = arith.mulf %104, %92 : vector<8x1xf32>
    %107 = arith.subf %105, %106 : vector<8x1xf32>
    %108 = vector.broadcast %104 : vector<8x1xf32> to vector<8x512xf32>
    %109 = arith.mulf %88, %108 : vector<8x512xf32>
    %110 = vector.broadcast %107 : vector<8x1xf32> to vector<8x512xf32>
    %111 = arith.addf %109, %110 : vector<8x512xf32>
    %cst_45 = arith.constant 0.000000e+00 : f32
    %112 = vector.broadcast %cst_45 : f32 to vector<8x512xf32>
    %113 = arith.maximumf %111, %112 : vector<8x512xf32>
    %c17_i32_46 = arith.constant 17 : i32
    %114 = tpu.dynamic_rotate %113 by %c17_i32_46 dim 1 : vector<8x512xf32>, i32 -> vector<8x512xf32>
    %cst_47 = arith.constant 0.000000e+00 : f32
    %115 = vector.shape_cast %13 : vector<1x512xi1> to vector<1x512xi1>
    %116 = vector.broadcast %115 : vector<1x512xi1> to vector<8x512xi1>
    %117 = vector.broadcast %cst_47 : f32 to vector<8x512xf32>
    %118 = arith.select %116, %114, %117 : vector<8x512xi1>, vector<8x512xf32>
    %c0_48 = arith.constant 0 : index
    %c0_49 = arith.constant 0 : index
    %119 = vector.load %arg9[%c0_48, %c0_49] : memref<72x512xf32, #tpu.memory_space<vmem>>, vector<8x512xf32>
    tpu.vector_store %arg9[%c0_48, %c0_49], %118 {strides = array<i32>} : memref<72x512xf32, #tpu.memory_space<vmem>>, vector<8x512xf32>,
    %c16_i32_50 = arith.constant 16 : i32
    %120 = tpu.dynamic_rotate %113 by %c16_i32_50 dim 1 : vector<8x512xf32>, i32 -> vector<8x512xf32>
    %cst_51 = arith.constant 0.000000e+00 : f32
    %121 = vector.shape_cast %15 : vector<1x512xi1> to vector<1x512xi1>
    %122 = vector.broadcast %121 : vector<1x512xi1> to vector<8x512xi1>
    %123 = vector.broadcast %cst_51 : f32 to vector<8x512xf32>
    %124 = arith.select %122, %120, %123 : vector<8x512xi1>, vector<8x512xf32>
    %c8 = arith.constant 8 : index
    %c0_52 = arith.constant 0 : index
    %125 = vector.load %arg9[%c8, %c0_52] : memref<72x512xf32, #tpu.memory_space<vmem>>, vector<8x512xf32>
    tpu.vector_store %arg9[%c8, %c0_52], %124 {strides = array<i32>} : memref<72x512xf32, #tpu.memory_space<vmem>>, vector<8x512xf32>,
    %c15_i32_53 = arith.constant 15 : i32
    %126 = tpu.dynamic_rotate %113 by %c15_i32_53 dim 1 : vector<8x512xf32>, i32 -> vector<8x512xf32>
    %cst_54 = arith.constant 0.000000e+00 : f32
    %127 = vector.shape_cast %20 : vector<1x512xi1> to vector<1x512xi1>
    %128 = vector.broadcast %127 : vector<1x512xi1> to vector<8x512xi1>
    %129 = vector.broadcast %cst_54 : f32 to vector<8x512xf32>
    %130 = arith.select %128, %126, %129 : vector<8x512xi1>, vector<8x512xf32>
    %c16_55 = arith.constant 16 : index
    %c0_56 = arith.constant 0 : index
    %131 = vector.load %arg9[%c16_55, %c0_56] : memref<72x512xf32, #tpu.memory_space<vmem>>, vector<8x512xf32>
    tpu.vector_store %arg9[%c16_55, %c0_56], %130 {strides = array<i32>} : memref<72x512xf32, #tpu.memory_space<vmem>>, vector<8x512xf32>,
    %c1_i32_57 = arith.constant 1 : i32
    %132 = tpu.dynamic_rotate %113 by %c1_i32_57 dim 1 : vector<8x512xf32>, i32 -> vector<8x512xf32>
    %cst_58 = arith.constant 0.000000e+00 : f32
    %133 = vector.shape_cast %22 : vector<1x512xi1> to vector<1x512xi1>
    %134 = vector.broadcast %133 : vector<1x512xi1> to vector<8x512xi1>
    %135 = vector.broadcast %cst_58 : f32 to vector<8x512xf32>
    %136 = arith.select %134, %132, %135 : vector<8x512xi1>, vector<8x512xf32>
    %c24 = arith.constant 24 : index
    %c0_59 = arith.constant 0 : index
    %137 = vector.load %arg9[%c24, %c0_59] : memref<72x512xf32, #tpu.memory_space<vmem>>, vector<8x512xf32>
    tpu.vector_store %arg9[%c24, %c0_59], %136 {strides = array<i32>} : memref<72x512xf32, #tpu.memory_space<vmem>>, vector<8x512xf32>,
    %c32_60 = arith.constant 32 : index
    %c0_61 = arith.constant 0 : index
    %138 = vector.load %arg9[%c32_60, %c0_61] : memref<72x512xf32, #tpu.memory_space<vmem>>, vector<8x512xf32>
    tpu.vector_store %arg9[%c32_60, %c0_61], %113 {strides = array<i32>} : memref<72x512xf32, #tpu.memory_space<vmem>>, vector<8x512xf32>,
    %c511_i32_62 = arith.constant 511 : i32
    %139 = tpu.dynamic_rotate %113 by %c511_i32_62 dim 1 : vector<8x512xf32>, i32 -> vector<8x512xf32>
    %cst_63 = arith.constant 0.000000e+00 : f32
    %140 = vector.shape_cast %24 : vector<1x512xi1> to vector<1x512xi1>
    %141 = vector.broadcast %140 : vector<1x512xi1> to vector<8x512xi1>
    %142 = vector.broadcast %cst_63 : f32 to vector<8x512xf32>
    %143 = arith.select %141, %139, %142 : vector<8x512xi1>, vector<8x512xf32>
    %c40 = arith.constant 40 : index
    %c0_64 = arith.constant 0 : index
    %144 = vector.load %arg9[%c40, %c0_64] : memref<72x512xf32, #tpu.memory_space<vmem>>, vector<8x512xf32>
    tpu.vector_store %arg9[%c40, %c0_64], %143 {strides = array<i32>} : memref<72x512xf32, #tpu.memory_space<vmem>>, vector<8x512xf32>,
    %c497_i32_65 = arith.constant 497 : i32
    %145 = tpu.dynamic_rotate %113 by %c497_i32_65 dim 1 : vector<8x512xf32>, i32 -> vector<8x512xf32>
    %cst_66 = arith.constant 0.000000e+00 : f32
    %146 = vector.shape_cast %29 : vector<1x512xi1> to vector<1x512xi1>
    %147 = vector.broadcast %146 : vector<1x512xi1> to vector<8x512xi1>
    %148 = vector.broadcast %cst_66 : f32 to vector<8x512xf32>
    %149 = arith.select %147, %145, %148 : vector<8x512xi1>, vector<8x512xf32>
    %c48_67 = arith.constant 48 : index
    %c0_68 = arith.constant 0 : index
    %150 = vector.load %arg9[%c48_67, %c0_68] : memref<72x512xf32, #tpu.memory_space<vmem>>, vector<8x512xf32>
    tpu.vector_store %arg9[%c48_67, %c0_68], %149 {strides = array<i32>} : memref<72x512xf32, #tpu.memory_space<vmem>>, vector<8x512xf32>,
    %c496_i32_69 = arith.constant 496 : i32
    %151 = tpu.dynamic_rotate %113 by %c496_i32_69 dim 1 : vector<8x512xf32>, i32 -> vector<8x512xf32>
    %cst_70 = arith.constant 0.000000e+00 : f32
    %152 = vector.shape_cast %31 : vector<1x512xi1> to vector<1x512xi1>
    %153 = vector.broadcast %152 : vector<1x512xi1> to vector<8x512xi1>
    %154 = vector.broadcast %cst_70 : f32 to vector<8x512xf32>
    %155 = arith.select %153, %151, %154 : vector<8x512xi1>, vector<8x512xf32>
    %c56 = arith.constant 56 : index
    %c0_71 = arith.constant 0 : index
    %156 = vector.load %arg9[%c56, %c0_71] : memref<72x512xf32, #tpu.memory_space<vmem>>, vector<8x512xf32>
    tpu.vector_store %arg9[%c56, %c0_71], %155 {strides = array<i32>} : memref<72x512xf32, #tpu.memory_space<vmem>>, vector<8x512xf32>,
    %c495_i32_72 = arith.constant 495 : i32
    %157 = tpu.dynamic_rotate %113 by %c495_i32_72 dim 1 : vector<8x512xf32>, i32 -> vector<8x512xf32>
    %cst_73 = arith.constant 0.000000e+00 : f32
    %158 = vector.shape_cast %36 : vector<1x512xi1> to vector<1x512xi1>
    %159 = vector.broadcast %158 : vector<1x512xi1> to vector<8x512xi1>
    %160 = vector.broadcast %cst_73 : f32 to vector<8x512xf32>
    %161 = arith.select %159, %157, %160 : vector<8x512xi1>, vector<8x512xf32>
    %c64_74 = arith.constant 64 : index
    %c0_75 = arith.constant 0 : index
    %162 = vector.load %arg9[%c64_74, %c0_75] : memref<72x512xf32, #tpu.memory_space<vmem>>, vector<8x512xf32>
    tpu.vector_store %arg9[%c64_74, %c0_75], %161 {strides = array<i32>} : memref<72x512xf32, #tpu.memory_space<vmem>>, vector<8x512xf32>,
    %c0_76 = arith.constant 0 : index
    %c0_77 = arith.constant 0 : index
    %163 = vector.load %arg4[%c0_76, %c0_77] : memref<8x72xf32, #tpu.memory_space<vmem>>, vector<8x72xf32>
    %c0_78 = arith.constant 0 : index
    %c0_79 = arith.constant 0 : index
    %164 = vector.load %arg9[%c0_78, %c0_79] : memref<72x512xf32, #tpu.memory_space<vmem>>, vector<72x512xf32>
    %cst_80 = arith.constant dense<0.000000e+00> : vector<8x512xf32>
    %165 = tpu.matmul %163, %164, %cst_80 {dimension_numbers = #tpu.dot_dimension_numbers<[1], [0], [0], [1], [0, 0, 1, 1], [], []>} : vector<8x72xf32>, vector<72x512xf32>, vector<8x512xf32> -> vector<8x512xf32>
    %cst_81 = arith.constant dense<0.000000e+00> : vector<8xf32>
    %166 = vector.multi_reduction <add>, %165, %cst_81 [1] : vector<8x512xf32> to vector<8xf32>
    %167 = vector.shape_cast %166 : vector<8xf32> to vector<8x1xf32>
    %cst_82 = arith.constant 0.001953125 : f32
    %168 = vector.broadcast %cst_82 : f32 to vector<8x1xf32>
    %169 = arith.mulf %167, %168 : vector<8x1xf32>
    %170 = arith.mulf %165, %165 : vector<8x512xf32>
    %cst_83 = arith.constant dense<0.000000e+00> : vector<8xf32>
    %171 = vector.multi_reduction <add>, %170, %cst_83 [1] : vector<8x512xf32> to vector<8xf32>
    %172 = vector.shape_cast %171 : vector<8xf32> to vector<8x1xf32>
    %cst_84 = arith.constant 0.001953125 : f32
    %173 = vector.broadcast %cst_84 : f32 to vector<8x1xf32>
    %174 = arith.mulf %172, %173 : vector<8x1xf32>
    %175 = arith.mulf %169, %169 : vector<8x1xf32>
    %176 = arith.subf %174, %175 : vector<8x1xf32>
    %c0_85 = arith.constant 0 : index
    %c0_86 = arith.constant 0 : index
    %177 = vector.load %arg5[%c0_85, %c0_86] : memref<8x1xf32, #tpu.memory_space<vmem>>, vector<8x1xf32>
    %cst_87 = arith.constant 9.99999974E-6 : f32
    %178 = vector.broadcast %cst_87 : f32 to vector<8x1xf32>
    %179 = arith.addf %176, %178 : vector<8x1xf32>
    %180 = math.rsqrt %179 : vector<8x1xf32>
    %181 = arith.mulf %177, %180 : vector<8x1xf32>
    %c0_88 = arith.constant 0 : index
    %c0_89 = arith.constant 0 : index
    %182 = vector.load %arg6[%c0_88, %c0_89] : memref<8x1xf32, #tpu.memory_space<vmem>>, vector<8x1xf32>
    %183 = arith.mulf %181, %169 : vector<8x1xf32>
    %184 = arith.subf %182, %183 : vector<8x1xf32>
    %185 = vector.broadcast %181 : vector<8x1xf32> to vector<8x512xf32>
    %186 = arith.mulf %165, %185 : vector<8x512xf32>
    %187 = vector.broadcast %184 : vector<8x1xf32> to vector<8x512xf32>
    %188 = arith.addf %186, %187 : vector<8x512xf32>
    %189 = arith.addf %188, %1 : vector<8x512xf32>
    %cst_90 = arith.constant 0.000000e+00 : f32
    %190 = vector.broadcast %cst_90 : f32 to vector<8x512xf32>
    %191 = arith.maximumf %189, %190 : vector<8x512xf32>
    %c0_91 = arith.constant 0 : index
    %c0_92 = arith.constant 0 : index
    %192 = vector.load %arg7[%c0_91, %c0_92] : memref<8x512xf32, #tpu.memory_space<vmem>>, vector<8x512xf32>
    tpu.vector_store %arg7[%c0_91, %c0_92], %191 {strides = array<i32>} : memref<8x512xf32, #tpu.memory_space<vmem>>, vector<8x512xf32>,
    return
  }
}

</mosaic_0001>

<bundles_post_ra>
// kernel: inv_basicblock_forward.1
= control target key start
LH: loop header
LB: loop body
LE: loop exit
PB: predicated region body
PF: predicated region fallthrough
CT: control target
= control target key end

     0   :  { %s1276_s28 = smov 112   ;;  %s1277_s14 = smov 113   ;;  %v34_v8 = vlaneseq  ;;  %vm557_vm0 = vcmask 130048   ;;  %v2248_v33 = vmov 0  ;;  %v2252_v40 = vmov 0  ;;  %s2210_s0 = inlined_call_operand.vmem [shape: f32[16,512], index: 0, kind: input, shape index: {}]   ;;  %s2211_s1 = inlined_call_operand.vmem [shape: f32[8,144], index: 1, kind: input, shape index: {}]   ;;  %s2212_s2 = inlined_call_operand.vmem [shape: f32[8,1], index: 2, kind: input, shape index: {}]   ;;  %s2213_s3 = inlined_call_operand.vmem [shape: f32[8,1], index: 3, kind: input, shape index: {}]   ;;  %s2214_s4 = inlined_call_operand.vmem [shape: f32[8,72], index: 4, kind: input, shape index: {}]   ;;  %s2215_s5 = inlined_call_operand.vmem [shape: f32[8,1], index: 5, kind: input, shape index: {}]   ;;  %s2216_s6 = inlined_call_operand.vmem [shape: f32[8,1], index: 6, kind: input, shape index: {}]   ;;  %s2217_s7 = inlined_call_operand.vmem [shape: f32[8,512], index: 7, kind: output, shape index: {}]  }
   0x1   :  { %v1329_v0 = vld [vmem:[%s2210_s0 + $0x28] sm:$0xff]  ;;  %v1334_v1 = vld [vmem:[%s2210_s0 + $0x20] sm:$0xff]  ;;  %v1343_v2 = vld [vmem:[%s2210_s0 + $0x30] sm:$0xff]  ;;  %s1278_s19 = smov 127   ;;  %s1279_s20 = smov 1   ;;  %v2262_v63 = vmov 0 }
   0x2   :  { %391 = vrot.lane.b32.xlu0 %v1329_v0, %s1276_s28  ;;  %387 = vrot.lane.b32.xlu1 %v1334_v1, %s1276_s28  ;;  %v1348_v3 = vld [vmem:[%s2210_s0 + $0x8] sm:$0xff]  ;;  %v1357_v4 = vld [vmem:[%s2210_s0 + $0x10] sm:$0xff]  ;;  %s1280_s21 = smov 15   ;;  %s1281_s22 = smov 16   ;;  %v1470_v9 = vand.u32 127, %v34_v8 }
   0x3   :  { %v1362_v5 = vld [vmem:[%s2210_s0] sm:$0xff]  ;;  %v1375_v6 = vld [vmem:[%s2210_s0 + $0x38] sm:$0xff]  ;;  %s1282_s23 = smov 17   ;;  %s1283_s24 = smov 111   ;;  %v484_v12 = vld [vmem:[%s2211_s1 + $0x8] sm:$0xff] }
   0x4   :  { %v1388_v7 = vld [vmem:[%s2210_s0 + $0x18] sm:$0xff]  ;;  %v1477_v10 = vadd.s32 128, %v1470_v9  ;;  %v43_v13 = vshra.s32 %v1470_v9, 4  ;;  %1156 = vmatprep.mubr.msk.f32.mxu0 %vm557_vm0, %v484_v12  ;;  %1157 = vmatprep.mubr.msk.f32.mxu1 %vm557_vm0, %v484_v12  ;;  %vm2218_vm2 = vcmp.lt.s32.totalorder %v1470_v9, 112  ;;  %v1503_v18 = vadd.s32 384, %v1470_v9 }
   0x5   :  { %v1508_v22 = vadd.s32 256, %v1470_v9  ;;  %v39_v29 = vand.u32 15, %v1470_v9  ;;  %vm2220_vm5 = vcmp.lt.s32.totalorder %v1470_v9, 113  ;;  %vm2222_vm11 = vcmp.lt.s32.totalorder %v1470_v9, 127 }
   0x6   :  { %395 = vrot.lane.b32.xlu0 %v1343_v2, %s1276_s28  ;;  %389 = vrot.lane.b32.xlu1 %v1348_v3, %s1276_s28  ;;  %v44_v11 = vshra.s32 %v1477_v10, 4  ;;  %v1494_v17 = vand.u32 15, %v43_v13  ;;  %v40_v21 = vand.u32 15, %v1477_v10  ;;  %v46_v25 = vshra.s32 %v1503_v18, 4 }
   0x7   :  { %v45_v30 = vshra.s32 %v1508_v22, 4  ;;  %vm1552_vm7 = vcmp.ge.s32.totalorder %v39_v29, 1  ;;  %v42_v51 = vand.u32 15, %v1503_v18  ;;  %v41_v55 = vand.u32 15, %v1508_v22 }
   0x8   :  { %v1492_v14 = vand.u32 15, %v44_v11  ;;  %vm2223_vm3 = vcmp.le.s32.totalorder %v1494_v17, 14  ;;  %vm1523_vm4 = vcmp.ge.s32.totalorder %v40_v21, 1  ;;  %v1550_v34 = vand.u32 15, %v46_v25 }
   0x9   :  { %v1556_v38 = vand.u32 15, %v45_v30  ;;  %vm1566_vm8 = vmand %vm2223_vm3, %vm1552_vm7  ;;  %vm1603_vm12 = vcmp.le.s32.totalorder %v40_v21, 14  ;;  %vm1607_vm13 = vcmp.ge.s32.totalorder %v42_v51, 1  ;;  %vm1613_vm14 = vcmp.ge.s32.totalorder %v41_v55, 1 }
   0xa   :  { %393 = vrot.lane.b32.xlu0 %v1357_v4, %s1276_s28  ;;  %385 = vrot.lane.b32.xlu1 %v1362_v5, %s1276_s28  ;;  %vm2224_vm1 = vcmp.le.s32.totalorder %v1492_v14, 14  ;;  %v2253_v40 = vsel %vm1566_vm8, 4294967295, %v2252_v40  ;;  %vm2221_vm9 = vcmp.le.s32.totalorder %v1550_v34, 14  ;;  %vm1619_vm15 = vcmp.le.s32.totalorder %v39_v29, 14 }
   0xb   :  { %vm1546_vm6 = vmand %vm2224_vm1, %vm1523_vm4  ;;  %vm2219_vm10 = vcmp.le.s32.totalorder %v1556_v38, 14  ;;  %v2264_v11 = vmov 0 }
   0xc   :  { %v2249_v33 = vsel %vm1546_vm6, 4294967295, %v2248_v33  ;;  %vm1627_vm0 = vmand %vm2221_vm9, %vm1607_vm13 }
   0xd   :  { %v2263_v63 = vsel %vm1627_vm0, 4294967295, %v2262_v63 }
   0xe   :  { %342 = vrot.lane.b32.xlu0 %v1329_v0, %s1277_s14  ;;  %346 = vrot.lane.b32.xlu1 %v1343_v2, %s1277_s14 }
  0x12   :  { %399 = vrot.lane.b32.xlu0 %v1375_v6, %s1276_s28  ;;  %338 = vrot.lane.b32.xlu1 %v1334_v1, %s1277_s14 }
  0x16   :  { %340 = vrot.lane.b32.xlu0 %v1348_v3, %s1277_s14  ;;  %344 = vrot.lane.b32.xlu1 %v1357_v4, %s1277_s14 }
  0x1a   :  { %397 = vrot.lane.b32.xlu0 %v1388_v7, %s1276_s28  ;;  %336 = vrot.lane.b32.xlu1 %v1362_v5, %s1277_s14 }
  0x1e   :  { %293 = vrot.lane.b32.xlu0 %v1329_v0, %s1278_s19  ;;  %297 = vrot.lane.b32.xlu1 %v1343_v2, %s1278_s19 }
  0x22   :  { %350 = vrot.lane.b32.xlu0 %v1375_v6, %s1277_s14  ;;  %289 = vrot.lane.b32.xlu1 %v1334_v1, %s1278_s19 }
  0x26   :  { %291 = vrot.lane.b32.xlu0 %v1348_v3, %s1278_s19  ;;  %295 = vrot.lane.b32.xlu1 %v1357_v4, %s1278_s19 }
  0x2a   :  { %348 = vrot.lane.b32.xlu0 %v1388_v7, %s1277_s14  ;;  %287 = vrot.lane.b32.xlu1 %v1362_v5, %s1278_s19 }
  0x2e   :  { %301 = vrot.lane.b32.xlu0 %v1375_v6, %s1278_s19  ;;  %299 = vrot.lane.b32.xlu1 %v1388_v7, %s1278_s19 }
  0x32   :  { %232 = vrot.lane.b32.xlu0 %v1334_v1, %s1279_s20  ;;  %236 = vrot.lane.b32.xlu1 %v1329_v0, %s1279_s20 }
  0x36   :  { %244 = vrot.lane.b32.xlu0 %v1375_v6, %s1279_s20  ;;  %230 = vrot.lane.b32.xlu1 %v1362_v5, %s1279_s20 }
  0x3a   :  { %234 = vrot.lane.b32.xlu0 %v1348_v3, %s1279_s20  ;;  %242 = vrot.lane.b32.xlu1 %v1388_v7, %s1279_s20 }
  0x3e   :  { %183 = vrot.lane.b32.xlu0 %v1334_v1, %s1280_s21  ;;  %187 = vrot.lane.b32.xlu1 %v1329_v0, %s1280_s21 }
  0x42   :  { %240 = vrot.lane.b32.xlu0 %v1343_v2, %s1279_s20  ;;  %195 = vrot.lane.b32.xlu1 %v1375_v6, %s1280_s21 }
  0x46   :  { %181 = vrot.lane.b32.xlu0 %v1362_v5, %s1280_s21  ;;  %185 = vrot.lane.b32.xlu1 %v1348_v3, %s1280_s21 }
  0x4a   :  { %238 = vrot.lane.b32.xlu0 %v1357_v4, %s1279_s20  ;;  %193 = vrot.lane.b32.xlu1 %v1388_v7, %s1280_s21 }
  0x4e   :  { %134 = vrot.lane.b32.xlu0 %v1334_v1, %s1281_s22  ;;  %138 = vrot.lane.b32.xlu1 %v1329_v0, %s1281_s22 }
  0x52   :  { %191 = vrot.lane.b32.xlu0 %v1343_v2, %s1280_s21  ;;  %146 = vrot.lane.b32.xlu1 %v1375_v6, %s1281_s22 }
  0x56   :  { %132 = vrot.lane.b32.xlu0 %v1362_v5, %s1281_s22  ;;  %136 = vrot.lane.b32.xlu1 %v1348_v3, %s1281_s22 }
  0x5a   :  { %189 = vrot.lane.b32.xlu0 %v1357_v4, %s1280_s21  ;;  %144 = vrot.lane.b32.xlu1 %v1388_v7, %s1281_s22 }
  0x5e   :  { %85 = vrot.lane.b32.xlu0 %v1334_v1, %s1282_s23  ;;  %89 = vrot.lane.b32.xlu1 %v1329_v0, %s1282_s23 }
  0x62   :  { %142 = vrot.lane.b32.xlu0 %v1343_v2, %s1281_s22  ;;  %97 = vrot.lane.b32.xlu1 %v1375_v6, %s1282_s23 }
  0x66   :  { %83 = vrot.lane.b32.xlu0 %v1362_v5, %s1282_s23  ;;  %87 = vrot.lane.b32.xlu1 %v1348_v3, %s1282_s23 }
  0x6a   :  { %140 = vrot.lane.b32.xlu0 %v1357_v4, %s1281_s22  ;;  %95 = vrot.lane.b32.xlu1 %v1388_v7, %s1282_s23 }
  0x6e   :  { %93 = vrot.lane.b32.xlu0 %v1343_v2, %s1282_s23  ;;  %440 = vrot.lane.b32.xlu1 %v1329_v0, %s1283_s24 }
  0x72   :  { %444 = vrot.lane.b32.xlu0 %v1343_v2, %s1283_s24  ;;  %436 = vrot.lane.b32.xlu1 %v1334_v1, %s1283_s24 }
  0x74   :  { %v392_v15 = vpop.permute.xlu0 %391  ;;  %v388_v16 = vpop.permute.xlu1 %387 }
  0x75   :  { %v407_v24 = vsel %vm2218_vm2, %v388_v16, %v392_v15 }
  0x76   :  { %91 = vrot.lane.b32.xlu0 %v1357_v4, %s1282_s23  ;;  %438 = vrot.lane.b32.xlu1 %v1348_v3, %s1283_s24 }
  0x78   :  { %v396_v19 = vpop.permute.xlu0 %395  ;;  %v390_v20 = vpop.permute.xlu1 %389 }
  0x79   :  { %v405_v23 = vsel %vm2218_vm2, %v392_v15, %v396_v19 }
  0x7a   :  { %1160 = vmatprep.subr.msk.mxu0 %vm2224_vm1, %v405_v23  ;;  %442 = vrot.lane.b32.xlu0 %v1357_v4, %s1283_s24 }
  0x7b   :  { %434 = vrot.lane.b32.xlu1 %v1362_v5, %s1283_s24  ;;  %1161 = vmatpush1.msk.msra.mxu0 %vm2223_vm3, %v407_v24 }
  0x7c   :  { %v394_v26 = vpop.permute.xlu0 %393  ;;  %v386_v27 = vpop.permute.xlu1 %385 }
  0x7d   :  { %v404_v31 = vsel %vm2218_vm2, %v390_v20, %v394_v26  ;;  %v406_v32 = vsel %vm2218_vm2, %v386_v27, %v390_v20 }
  0x7e   :  { %1162 = vmatprep.subr.msk.mxu0 %vm2224_vm1, %v404_v31  ;;  %448 = vrot.lane.b32.xlu0 %v1375_v6, %s1283_s24 }
  0x7f   :  { %446 = vrot.lane.b32.xlu1 %v1388_v7, %s1283_s24  ;;  %1163 = vmatpush1.msk.msra.mxu0 %vm2223_vm3, %v406_v32  ;;  %vm2230_vm3 = vcmp.lt.s32.totalorder %v1470_v9, 15 }
  0x80   :  { %v343_v35 = vpop.permute.xlu0 %342  ;;  %v347_v36 = vpop.permute.xlu1 %346 }
  0x81   :  { %v356_v39 = vsel %vm2220_vm5, %v343_v35, %v347_v36 }
  0x82   :  { %1164 = vmatprep.subr.msk.mxu0 %vm1546_vm6, %v356_v39 }
  0x84   :  { %v400_v41 = vpop.permute.xlu0 %399  ;;  %v339_v42 = vpop.permute.xlu1 %338 }
  0x85   :  { %v358_v43 = vsel %vm2220_vm5, %v339_v42, %v343_v35  ;;  %v409_v44 = vsel %vm2218_vm2, %v400_v41, %v388_v16  ;;  %v403_v45 = vsel %vm2218_vm2, %v396_v19, %v400_v41 }
  0x86   :  { %1165 = vmatpush1.msk.msra.mxu0 %vm1566_vm8, %v358_v43  ;;  %1192 = vmatprep.subr.msk.mxu1 %vm2221_vm9, %v409_v44 }
  0x87   :  { %1193 = vmatpush1.msk.msra.mxu1 %vm2219_vm10, %v403_v45  ;;  %v2272_v45 = vmov 0 }
  0x88   :  { %v341_v46 = vpop.permute.xlu0 %340  ;;  %v345_v47 = vpop.permute.xlu1 %344 }
  0x89   :  { %v355_v48 = vsel %vm2220_vm5, %v341_v46, %v345_v47 }
  0x8a   :  { %1166 = vmatprep.subr.msk.mxu0 %vm1546_vm6, %v355_v48  ;;  %vm2290_vm6 = vcmp.ge.s32.totalorder %v1494_v17, 1 }
  0x8c   :  { %v398_v49 = vpop.permute.xlu0 %397  ;;  %v337_v50 = vpop.permute.xlu1 %336 }
  0x8d   :  { %v402_v52 = vsel %vm2218_vm2, %v394_v26, %v398_v49  ;;  %v408_v53 = vsel %vm2218_vm2, %v398_v49, %v386_v27  ;;  %v357_v54 = vsel %vm2220_vm5, %v337_v50, %v341_v46  ;;  %vm1635_vm2 = vmand %vm2219_vm10, %vm1613_vm14 }
  0x8e   :  { %1167 = vmatpush1.msk.msra.mxu0 %vm1566_vm8, %v357_v54  ;;  %1194 = vmatprep.subr.msk.mxu1 %vm2221_vm9, %v408_v53  ;;  %v2265_v11 = vsel %vm1635_vm2, 4294967295, %v2264_v11  ;;  %vm2225_vm9 = vcmp.lt.s32.totalorder %v1470_v9, 1  ;;  %vm2285_vm8 = vcmp.ge.s32.totalorder %v1494_v17, 1 }
  0x8f   :  { %1195 = vmatpush1.msk.msra.mxu1 %vm2219_vm10, %v402_v52  ;;  %vm1668_vm10 = vcmp.le.s32.totalorder %v42_v51, 14 }
  0x90   :  { %v294_v57 = vpop.permute.xlu0 %293  ;;  %v298_v58 = vpop.permute.xlu1 %297 }
  0x91   :  { %v307_v60 = vsel %vm2222_vm11, %v294_v57, %v298_v58 }
  0x92   :  { %1168 = vmatprep.subr.msk.mxu0 %vm1603_vm12, %v307_v60 }
  0x94   :  { %v351_v8 = vpop.permute.xlu0 %350  ;;  %v290_v10 = vpop.permute.xlu1 %289 }
  0x95   :  { %v354_v12 = vsel %vm2220_vm5, %v347_v36, %v351_v8  ;;  %v360_v13 = vsel %vm2220_vm5, %v351_v8, %v339_v42  ;;  %v309_v15 = vsel %vm2222_vm11, %v290_v10, %v294_v57 }
  0x96   :  { %1169 = vmatpush1.msk.msra.mxu0 %vm1619_vm15, %v309_v15  ;;  %1196 = vmatprep.subr.msk.mxu1 %vm1627_vm0, %v360_v13  ;;  %v2278_v13 = vmov 0 }
  0x97   :  { %1197 = vmatpush1.msk.msra.mxu1 %vm1635_vm2, %v354_v12 }
  0x98   :  { %v292_v16 = vpop.permute.xlu0 %291  ;;  %v296_v18 = vpop.permute.xlu1 %295 }
  0x99   :  { %v306_v19 = vsel %vm2222_vm11, %v292_v16, %v296_v18 }
  0x9a   :  { %1170 = vmatprep.subr.msk.mxu0 %vm1603_vm12, %v306_v19 }
  0x9c   :  { %v349_v20 = vpop.permute.xlu0 %348  ;;  %v288_v21 = vpop.permute.xlu1 %287 }
  0x9d   :  { %v353_v22 = vsel %vm2220_vm5, %v345_v47, %v349_v20  ;;  %v359_v23 = vsel %vm2220_vm5, %v349_v20, %v337_v50  ;;  %v308_v24 = vsel %vm2222_vm11, %v288_v21, %v292_v16  ;;  %vm1673_vm5 = vcmp.le.s32.totalorder %v41_v55, 14 }
  0x9e   :  { %1171 = vmatpush1.msk.msra.mxu0 %vm1619_vm15, %v308_v24  ;;  %1198 = vmatprep.subr.msk.mxu1 %vm1627_vm0, %v359_v23 }
  0x9f   :  { %1199 = vmatpush1.msk.msra.mxu1 %vm1635_vm2, %v353_v22  ;;  %573 = vmatprep.subr.mxu0 %v1329_v0 }
  0xa0   :  { %v302_v26 = vpop.permute.xlu0 %301  ;;  %v300_v27 = vpop.permute.xlu1 %299  ;;  %574 = vmatpush1.msra.mxu0 %v1334_v1 }
  0xa1   :  { %v305_v30 = vsel %vm2222_vm11, %v298_v58, %v302_v26  ;;  %v311_v31 = vsel %vm2222_vm11, %v302_v26, %v290_v10  ;;  %575 = vmatprep.subr.mxu0 %v1348_v3  ;;  %v310_v0 = vsel %vm2222_vm11, %v300_v27, %v288_v21  ;;  %v304_v1 = vsel %vm2222_vm11, %v296_v18, %v300_v27 }
  0xa2   :  { %1200 = vmatprep.subr.msk.mxu1 %vm1668_vm10, %v311_v31  ;;  %576 = vmatpush1.msra.mxu0 %v1362_v5  ;;  %vm2227_vm11 = vcmp.ge.s32.totalorder %v1492_v14, 1  ;;  %v2280_v18 = vmov 0 }
  0xa3   :  { %1201 = vmatpush1.msk.msra.mxu1 %vm1673_vm5, %v305_v30  ;;  %vm1722_vm1 = vmand %vm2227_vm11, %vm1603_vm12  ;;  %vm2274_vm11 = vcmp.lt.s32.totalorder %v1470_v9, 1 }
  0xa4   :  { %v233_v32 = vpop.permute.xlu0 %232  ;;  %1202 = vmatprep.subr.msk.mxu1 %vm1668_vm10, %v310_v0  ;;  %v237_v3 = vpop.permute.xlu1 %236  ;;  %vm2275_vm0 = vmmov %vm2274_vm11 }
  0xa5   :  { %v252_v35 = vsel %vm2225_vm9, %v233_v32, %v237_v3  ;;  %1203 = vmatpush1.msk.msra.mxu1 %vm1673_vm5, %v304_v1  ;;  %v2291_v1 = vmov 0 }
  0xa6   :  { %1172 = vmatprep.subr.msk.mxu0 %vm1523_vm4, %v252_v35  ;;  %644 = vmatprep.subr.mxu1 %v1375_v6 }
  0xa7   :  { %645 = vmatpush1.msra.mxu1 %v1343_v2 }
  0xa8   :  { %v245_v5 = vpop.permute.xlu0 %244  ;;  %v231_v36 = vpop.permute.xlu1 %230  ;;  %646 = vmatprep.subr.mxu1 %v1388_v7 }
  0xa9   :  { %v254_v39 = vsel %vm2225_vm9, %v245_v5, %v233_v32  ;;  %647 = vmatpush1.msra.mxu1 %v1357_v4  ;;  %v2270_v4 = vmov 0 }
  0xaa   :  { %1173 = vmatpush1.msk.msra.mxu0 %vm1552_vm7, %v254_v39  ;;  %v2271_v4 = vsel %vm1722_vm1, 4294967295, %v2270_v4 }
  0xac   :  { %v235_v41 = vpop.permute.xlu0 %234  ;;  %v243_v42 = vpop.permute.xlu1 %242 }
  0xad   :  { %v251_v6 = vsel %vm2225_vm9, %v231_v36, %v235_v41  ;;  %v253_v2 = vsel %vm2225_vm9, %v243_v42, %v231_v36  ;;  %vm2229_vm9 = vcmp.ge.s32.totalorder %v1494_v17, 1 }
  0xae   :  { %1174 = vmatprep.subr.msk.mxu0 %vm1523_vm4, %v251_v6  ;;  %vm1735_vm2 = vmand %vm2229_vm9, %vm1619_vm15  ;;  %vm2232_vm9 = vcmp.lt.s32.totalorder %v1470_v9, 16 }
  0xaf   :  { %1175 = vmatpush1.msk.msra.mxu0 %vm1552_vm7, %v253_v2  ;;  %v2273_v45 = vsel %vm1735_vm2, 4294967295, %v2272_v45 }
  0xb0   :  { %v184_v7 = vpop.permute.xlu0 %183  ;;  %v188_v43 = vpop.permute.xlu1 %187 }
  0xb1   :  { %v203_v44 = vsel %vm2230_vm3, %v184_v7, %v188_v43 }
  0xb2   :  { %1176 = vmatprep.subr.msk.mxu0 %vm1722_vm1, %v203_v44 }
  0xb4   :  { %v241_v46 = vpop.permute.xlu0 %240  ;;  %v196_v47 = vpop.permute.xlu1 %195 }
  0xb5   :  { %v248_v48 = vsel %vm2274_vm11, %v241_v46, %v245_v5  ;;  %v250_v49 = vsel %vm2275_vm0, %v237_v3, %v241_v46  ;;  %v205_v50 = vsel %vm2230_vm3, %v196_v47, %v184_v7  ;;  %vm2276_vm11 = vmmov %vm2275_vm0  ;;  %v2293_v5 = vmov 0 }
  0xb6   :  { %1177 = vmatpush1.msk.msra.mxu0 %vm1735_vm2, %v205_v50  ;;  %1204 = vmatprep.subr.msk.mxu1 %vm1607_vm13, %v248_v48  ;;  %v2300_v50 = vmov 0 }
  0xb7   :  { %1205 = vmatpush1.msk.msra.mxu1 %vm1613_vm14, %v250_v49 }
  0xb8   :  { %v182_v51 = vpop.permute.xlu0 %181  ;;  %v186_v52 = vpop.permute.xlu1 %185 }
  0xb9   :  { %v202_v53 = vsel %vm2230_vm3, %v182_v51, %v186_v52 }
  0xba   :  { %1178 = vmatprep.subr.msk.mxu0 %vm1722_vm1, %v202_v53  ;;  %v2303_v53 = vmov 0 }
  0xbc   :  { %v239_v54 = vpop.permute.xlu0 %238  ;;  %v194_v55 = vpop.permute.xlu1 %193 }
  0xbd   :  { %v247_v57 = vsel %vm2276_vm11, %v239_v54, %v243_v42  ;;  %v249_v58 = vsel %vm2275_vm0, %v235_v41, %v239_v54  ;;  %v204_v60 = vsel %vm2230_vm3, %v194_v55, %v182_v51  ;;  %vm2234_vm11 = vcmp.ge.s32.totalorder %v1550_v34, 1 }
  0xbe   :  { %1179 = vmatpush1.msk.msra.mxu0 %vm1735_vm2, %v204_v60  ;;  %1206 = vmatprep.subr.msk.mxu1 %vm1607_vm13, %v247_v57  ;;  %vm2236_vm0 = vcmp.ge.s32.totalorder %v1556_v38, 1  ;;  %vm2277_vm3 = vcmp.ge.s32.totalorder %v1492_v14, 1  ;;  %vm1778_vm2 = vmand %vm2234_vm11, %vm1668_vm10  ;;  %vm2284_vm11 = vcmp.lt.s32.totalorder %v1470_v9, 16 }
  0xbf   :  { %1207 = vmatpush1.msk.msra.mxu1 %vm1613_vm14, %v249_v58  ;;  %v2279_v13 = vsel %vm1778_vm2, 4294967295, %v2278_v13 }
  0xc0   :  { %v135_v8 = vpop.permute.xlu0 %134  ;;  %v139_v10 = vpop.permute.xlu1 %138 }
  0xc1   :  { %v154_v12 = vsel %vm2232_vm9, %v135_v8, %v139_v10  ;;  %vm1786_vm9 = vmand %vm2236_vm0, %vm1673_vm5 }
  0xc2   :  { %1180 = vmatprep.subr.msk.mxu0 %vm2277_vm3, %v154_v12  ;;  %v2281_v18 = vsel %vm1786_vm9, 4294967295, %v2280_v18  ;;  %vm2282_vm3 = vcmp.lt.s32.totalorder %v1470_v9, 15  ;;  %vm2286_vm0 = vmmov %vm2284_vm11 }
  0xc3   :  { %vm2283_vm1 = vmmov %vm2282_vm3 }
  0xc4   :  { %v192_v15 = vpop.permute.xlu0 %191  ;;  %v147_v16 = vpop.permute.xlu1 %146 }
  0xc5   :  { %v199_v19 = vsel %vm2282_vm3, %v192_v15, %v196_v47  ;;  %v201_v20 = vsel %vm2283_vm1, %v188_v43, %v192_v15  ;;  %v156_v21 = vsel %vm2284_vm11, %v147_v16, %v135_v8  ;;  %vm2287_vm3 = vcmp.ge.s32.totalorder %v1492_v14, 1  ;;  %vm2289_vm11 = vmmov %vm2286_vm0 }
  0xc6   :  { %1181 = vmatpush1.msk.msra.mxu0 %vm2285_vm8, %v156_v21  ;;  %1208 = vmatprep.subr.msk.mxu1 %vm1778_vm2, %v199_v19  ;;  %vm2288_vm8 = vmmov %vm2283_vm1 }
  0xc7   :  { %1209 = vmatpush1.msk.msra.mxu1 %vm1786_vm9, %v201_v20 }
  0xc8   :  { %v133_v22 = vpop.permute.xlu0 %132  ;;  %v137_v23 = vpop.permute.xlu1 %136 }
  0xc9   :  { %v153_v24 = vsel %vm2286_vm0, %v133_v22, %v137_v23  ;;  %vm2240_vm0 = vcmp.lt.s32.totalorder %v1470_v9, 17 }
  0xca   :  { %1182 = vmatprep.subr.msk.mxu0 %vm2287_vm3, %v153_v24  ;;  %v483_v24 = vld [vmem:[%s2211_s1] sm:$0xff] }
  0xcc   :  { %v190_v26 = vpop.permute.xlu0 %189  ;;  %v145_v27 = vpop.permute.xlu1 %144 }
  0xcd   :  { %v198_v30 = vsel %vm2283_vm1, %v190_v26, %v194_v55  ;;  %v200_v31 = vsel %vm2288_vm8, %v186_v52, %v190_v26  ;;  %v155_v0 = vsel %vm2289_vm11, %v145_v27, %v133_v22  ;;  %vm1823_vm1 = vmand %vm2287_vm3, %vm1523_vm4 }
  0xce   :  { %1183 = vmatpush1.msk.msra.mxu0 %vm2290_vm6, %v155_v0  ;;  %1210 = vmatprep.subr.msk.mxu1 %vm1778_vm2, %v198_v30  ;;  %v2292_v1 = vsel %vm1823_vm1, 4294967295, %v2291_v1  ;;  %vm1835_vm8 = vmand %vm2290_vm6, %vm1552_vm7  ;;  %vm2297_vm6 = vcmp.ge.s32.totalorder %v1556_v38, 1 }
  0xcf   :  { %1211 = vmatpush1.msk.msra.mxu1 %vm1786_vm9, %v200_v31  ;;  %v2294_v5 = vsel %vm1835_vm8, 4294967295, %v2293_v5  ;;  %vm2295_vm3 = vmmov %vm2289_vm11  ;;  %vm2296_vm9 = vcmp.ge.s32.totalorder %v1550_v34, 1 }
  0xd0   :  { %v86_v32 = vpop.permute.xlu0 %85  ;;  %v90_v3 = vpop.permute.xlu1 %89 }
  0xd1   :  { %v105_v35 = vsel %vm2240_vm0, %v86_v32, %v90_v3 }
  0xd2   :  { %1184 = vmatprep.subr.msk.mxu0 %vm1823_vm1, %v105_v35 }
  0xd4   :  { %v143_v36 = vpop.permute.xlu0 %142  ;;  %v98_v39 = vpop.permute.xlu1 %97 }
  0xd5   :  { %v150_v41 = vsel %vm2289_vm11, %v143_v36, %v147_v16  ;;  %v152_v42 = vsel %vm2295_vm3, %v139_v10, %v143_v36  ;;  %v107_v6 = vsel %vm2240_vm0, %v98_v39, %v86_v32  ;;  %vm2298_vm11 = vmmov %vm2295_vm3 }
  0xd6   :  { %1185 = vmatpush1.msk.msra.mxu0 %vm1835_vm8, %v107_v6  ;;  %1212 = vmatprep.subr.msk.mxu1 %vm2296_vm9, %v150_v41 }
  0xd7   :  { %1213 = vmatpush1.msk.msra.mxu1 %vm2297_vm6, %v152_v42 }
  0xd8   :  { %v84_v2 = vpop.permute.xlu0 %83  ;;  %v88_v7 = vpop.permute.xlu1 %87 }
  0xd9   :  { %v104_v43 = vsel %vm2240_vm0, %v84_v2, %v88_v7 }
  0xda   :  { %1186 = vmatprep.subr.msk.mxu0 %vm1823_vm1, %v104_v43  ;;  %vm2299_vm1 = vmmov %vm2296_vm9 }
  0xdc   :  { %v141_v44 = vpop.permute.xlu0 %140  ;;  %v96_v46 = vpop.permute.xlu1 %95 }
  0xdd   :  { %v149_v47 = vsel %vm2298_vm11, %v141_v44, %v145_v27  ;;  %v151_v48 = vsel %vm2295_vm3, %v137_v23, %v141_v44  ;;  %v106_v49 = vsel %vm2240_vm0, %v96_v46, %v84_v2  ;;  %vm1871_vm11 = vmand %vm2299_vm1, %vm1607_vm13  ;;  %vm2242_vm1 = vcmp.lt.s32.totalorder %v1470_v9, 111 }
  0xde   :  { %1187 = vmatpush1.msk.msra.mxu0 %vm1835_vm8, %v106_v49  ;;  %1214 = vmatprep.subr.msk.mxu1 %vm2296_vm9, %v149_v47  ;;  %v2301_v50 = vsel %vm1871_vm11, 4294967295, %v2300_v50  ;;  %vm2302_vm3 = vmmov %vm2297_vm6  ;;  %vm2305_vm9 = vcmp.lt.s32.totalorder %v1470_v9, 17 }
  0xdf   :  { %1215 = vmatpush1.msk.msra.mxu1 %vm2297_vm6, %v151_v48  ;;  %vm1879_vm0 = vmand %vm2302_vm3, %vm1613_vm14  ;;  %vm2307_vm3 = vcmp.le.s32.totalorder %v1492_v14, 14 }
  0xe0   :  { %v94_v51 = vpop.permute.xlu0 %93  ;;  %v441_v52 = vpop.permute.xlu1 %440  ;;  %v2304_v53 = vsel %vm1879_vm0, 4294967295, %v2303_v53  ;;  %vm2306_vm6 = vmmov %vm2305_vm9 }
  0xe1   :  { %v101_v54 = vsel %vm2305_vm9, %v94_v51, %v98_v39  ;;  %v103_v55 = vsel %vm2306_vm6, %v90_v3, %v94_v51  ;;  %vm1896_vm8 = vmand %vm2307_vm3, %vm1603_vm12  ;;  %vm2310_vm9 = vcmp.le.s32.totalorder %v1494_v17, 14  ;;  %vm2313_vm3 = vcmp.lt.s32.totalorder %v1470_v9, 17 }
  0xe2   :  { %1216 = vmatprep.subr.msk.mxu1 %vm1871_vm11, %v101_v54  ;;  %vm1904_vm6 = vmand %vm2310_vm9, %vm1619_vm15  ;;  %v1284_v54 = vmov 0  }
  0xe3   :  { %1217 = vmatpush1.msk.msra.mxu1 %vm1879_vm0, %v103_v55  ;;  %vm2314_vm9 = vmmov %vm2313_vm3  ;;  %1266 = vset.pattern.permute.xlu0 %v1284_v54 }
  0xe4   :  { %v445_v58 = vpop.permute.xlu0 %444  ;;  %v437_v60 = vpop.permute.xlu1 %436  ;;  %1267 = vset.pattern.permute.xlu1 %v1284_v54 }
  0xe5   :  { %v454_v10 = vsel %vm2242_vm1, %v441_v52, %v445_v58  ;;  %v456_v12 = vsel %vm2242_vm1, %v437_v60, %v441_v52 }
  0xe6   :  { %1188 = vmatprep.subr.msk.mxu0 %vm1896_vm8, %v454_v10 }
  0xe7   :  { %1189 = vmatpush2.msk.msra.mxu0 %vm1904_vm6, %v456_v12 }
  0xe8   :  { %v92_v15 = vpop.permute.xlu0 %91  ;;  %v439_v16 = vpop.permute.xlu1 %438 }
  0xe9   :  { %v100_v19 = vsel %vm2313_vm3, %v92_v15, %v96_v46  ;;  %v102_v20 = vsel %vm2314_vm9, %v88_v7, %v92_v15  ;;  %vm2315_vm3 = vcmp.le.s32.totalorder %v1550_v34, 14 }
  0xea   :  { %1218 = vmatprep.subr.msk.mxu1 %vm1871_vm11, %v100_v19  ;;  %vm1939_vm9 = vmand %vm2315_vm3, %vm1668_vm10  ;;  %vm2321_vm11 = vcmp.lt.s32.totalorder %v1470_v9, 111  ;;  %v721_v19 = vld [vmem:[%s2212_s2] sm:$0xff] }
  0xeb   :  { %1219 = vmatpush1.msk.msra.mxu1 %vm1879_vm0, %v102_v20  ;;  %vm2322_vm2 = vmmov %vm2321_vm11 }
  0xec   :  { %v443_v21 = vpop.permute.xlu0 %442  ;;  %vm2323_vm3 = vmmov %vm2322_vm2 }
  0xed   :  { %v453_v22 = vsel %vm2242_vm1, %v439_v16, %v443_v21  ;;  %v435_v23 = vpop.permute.xlu1 %434 }
  0xee   :  { %v455_v26 = vsel %vm2242_vm1, %v435_v23, %v439_v16  ;;  %1190 = vmatprep.subr.msk.mxu0 %vm1896_vm8, %v453_v22  ;;  %vm2318_vm1 = vcmp.le.s32.totalorder %v1556_v38, 14  ;;  %v725_v22 = vld [vmem:[%s2213_s3] sm:$0xff] }
  0xef   :  { %1191 = vmatpush2.msk.msra.mxu0 %vm1904_vm6, %v455_v26  ;;  %vm1947_vm0 = vmand %vm2318_vm1, %vm1673_vm5 }
  0xf0   :  { %v449_v30 = vpop.permute.xlu0 %448  ;;  %626 = vmatmul.mubr.f32.vlgmr.msra.gmra.mxu0 %v483_v24  ;;  %vm2324_vm1 = vmmov %vm2322_vm2 }
  0xf1   :  { %v452_v0 = vsel %vm2321_vm11, %v445_v58, %v449_v30  ;;  %v458_v32 = vsel %vm2322_vm2, %v449_v30, %v437_v60  ;;  %v447_v3 = vpop.permute.xlu1 %446  ;;  %vm2325_vm2 = vmmov %vm2324_vm1 }
  0xf2   :  { %1220 = vmatprep.subr.msk.mxu1 %vm1939_vm9, %v458_v32  ;;  %v457_v35 = vsel %vm2323_vm3, %v447_v3, %v435_v23  ;;  %v451_v36 = vsel %vm2324_vm1, %v443_v21, %v447_v3  ;;  %vm2326_vm11 = vmmov %vm2324_vm1 }
  0xf3   :  { %1221 = vmatpush2.msk.msra.mxu1 %vm1947_vm0, %v452_v0  ;;  %vm2327_vm3 = vmmov %vm2324_vm1 }
  0xf4   :  { %1222 = vmatprep.subr.msk.mxu1 %vm1939_vm9, %v457_v35 }
  0xf5   :  { %1223 = vmatpush2.msk.msra.mxu1 %vm1947_vm0, %v451_v36 }
  0xf6   :  { %697 = vmatmul.mubr.f32.vlgmr.msra.gmra.mxu1 %v483_v24 }
 0x1b0   :  { %v627_v39 = vpop.f32.mrf.mxu0 }
 0x1b1   :  { %v709_v42 = vmul.f32 %v627_v39, %v627_v39 }
 0x1b2   :  { %v629_v41 = vpop.f32.mrf.mxu0 }
 0x1b3   :  { %v710_v6 = vmul.f32 %v629_v41, %v629_v41  ;;  %v703_v2 = vadd.f32 %v629_v41, %v627_v39 }
 0x1b5   :  { %v713_v46 = vadd.f32 %v710_v6, %v709_v42 }
 0x1b6   :  { %v698_v7 = vpop.f32.mrf.mxu1 }
 0x1b7   :  { %v711_v43 = vmul.f32 %v698_v7, %v698_v7  ;;  %v704_v44 = vadd.f32 %v703_v2, %v698_v7 }
 0x1b8   :  { %v700_v47 = vpop.f32.mrf.mxu1 }
 0x1b9   :  { %v705_v48 = vadd.f32 %v704_v44, %v700_v47  ;;  %v712_v49 = vmul.f32 %v700_v47, %v700_v47  ;;  %v714_v51 = vadd.f32 %v713_v46, %v711_v43 }
 0x1bb   :  { %706 = vadd.xlane.f32.xlu0 %v705_v48  ;;  %v715_v52 = vadd.f32 %v714_v51, %v712_v49 }
 0x1bd   :  { %716 = vadd.xlane.f32.xlu1 %v715_v52 }
 0x244   :  { %v707_v55 = vpop.xlane.xlu0 %706 }
 0x245   :  { %v708_v58 = vmul.f32 0.001953125, %v707_v55 }
 0x246   :  { %v717_v60 = vpop.xlane.xlu1 %716 }
 0x247   :  { %v719_v10 = vmul.f32 %v708_v58, %v708_v58  ;;  %v718_v12 = vmul.f32 0.001953125, %v717_v60 }
 0x249   :  { %v720_v15 = vsub.f32 %v718_v12, %v719_v10 }
 0x24b   :  { %v722_v16 = vadd.f32 1e-05, %v720_v15 }
 0x24d   :  { %1268 = vrsqrt.f32 %v722_v16 }
 0x25a   :  { %v1269_v20 = vpop.eup %1268 }
 0x25b   :  { %v724_v21 = vmul.f32 %v1269_v20, %v721_v19 }
 0x25d   :  { %730 = vperm.xlu0 %1266, %v724_v21   ;;  %v726_v23 = vmul.f32 %v724_v21, %v708_v58 }
 0x25f   :  { %v727_v24 = vsub.f32 %v725_v22, %v726_v23 }
 0x261   :  { %739 = vperm.xlu1 %1267, %v727_v24  }
 0x2d8   :  { %v731_v26 = vpop.permute.xlu0 %730 }
 0x2d9   :  { %v734_v30 = vmul.f32 %v731_v26, %v629_v41  ;;  %v735_v32 = vmul.f32 %v731_v26, %v698_v7  ;;  %v736_v3 = vmul.f32 %v731_v26, %v700_v47  ;;  %v733_v2 = vmul.f32 %v731_v26, %v627_v39 }
 0x2da   :  { %v1285_v39 = vmov 0.0  }
 0x2db   :  { %1019 = vmatprep.mubr.f32.mxu0 %v1285_v39  ;;  %1090 = vmatprep.mubr.f32.mxu1 %v1285_v39 }
 0x2dc   :  { %v740_v0 = vpop.permute.xlu1 %739 }
 0x2dd   :  { %v743_v35 = vadd.f32 %v740_v0, %v734_v30  ;;  %v744_v36 = vadd.f32 %v740_v0, %v735_v32  ;;  %v745_v42 = vadd.f32 %v740_v0, %v736_v3  ;;  %v742_v43 = vadd.f32 %v740_v0, %v733_v2 }
 0x2df   :  { %v1973_v6 = vmax.f32 %v743_v35, 0.0  ;;  %v1979_v44 = vmax.f32 %v744_v36, 0.0  ;;  %v1981_v46 = vmax.f32 %v745_v42, 0.0  ;;  %v1987_v41 = vmax.f32 %v742_v43, 0.0 }
 0x2e1   :  { %856 = vrot.lane.b32.xlu0 %v1973_v6, %s1277_s14  ;;  %896 = vrot.lane.b32.xlu1 %v1973_v6, %s1283_s24 }
 0x2e5   :  { %900 = vrot.lane.b32.xlu0 %v1981_v46, %s1283_s24  ;;  %898 = vrot.lane.b32.xlu1 %v1979_v44, %s1283_s24 }
 0x2e9   :  { %836 = vrot.lane.b32.xlu0 %v1973_v6, %s1278_s19  ;;  %894 = vrot.lane.b32.xlu1 %v1987_v41, %s1283_s24 }
 0x2ed   :  { %880 = vrot.lane.b32.xlu0 %v1981_v46, %s1276_s28  ;;  %876 = vrot.lane.b32.xlu1 %v1973_v6, %s1276_s28 }
 0x2f1   :  { %860 = vrot.lane.b32.xlu0 %v1981_v46, %s1277_s14  ;;  %878 = vrot.lane.b32.xlu1 %v1979_v44, %s1276_s28 }
 0x2f5   :  { %812 = vrot.lane.b32.xlu0 %v1973_v6, %s1279_s20  ;;  %874 = vrot.lane.b32.xlu1 %v1987_v41, %s1276_s28 }
 0x2f9   :  { %816 = vrot.lane.b32.xlu0 %v1981_v46, %s1279_s20  ;;  %858 = vrot.lane.b32.xlu1 %v1979_v44, %s1277_s14 }
 0x2fd   :  { %792 = vrot.lane.b32.xlu0 %v1973_v6, %s1280_s21  ;;  %854 = vrot.lane.b32.xlu1 %v1987_v41, %s1277_s14 }
 0x301   :  { %770 = vrot.lane.b32.xlu0 %v1987_v41, %s1281_s22  ;;  %838 = vrot.lane.b32.xlu1 %v1979_v44, %s1278_s19 }
 0x305   :  { %814 = vrot.lane.b32.xlu0 %v1979_v44, %s1279_s20  ;;  %834 = vrot.lane.b32.xlu1 %v1987_v41, %s1278_s19 }
 0x309   :  { %750 = vrot.lane.b32.xlu0 %v1987_v41, %s1282_s23  ;;  %810 = vrot.lane.b32.xlu1 %v1987_v41, %s1279_s20 }
 0x30d   :  { %794 = vrot.lane.b32.xlu0 %v1979_v44, %s1280_s21  ;;  %840 = vrot.lane.b32.xlu1 %v1981_v46, %s1278_s19 }
 0x311   :  { %774 = vrot.lane.b32.xlu0 %v1979_v44, %s1281_s22  ;;  %790 = vrot.lane.b32.xlu1 %v1987_v41, %s1280_s21 }
 0x315   :  { %796 = vrot.lane.b32.xlu1 %v1981_v46, %s1280_s21 }
 0x319   :  { %772 = vrot.lane.b32.xlu1 %v1973_v6, %s1281_s22 }
 0x31d   :  { %776 = vrot.lane.b32.xlu1 %v1981_v46, %s1281_s22 }
 0x321   :  { %752 = vrot.lane.b32.xlu1 %v1973_v6, %s1282_s23 }
 0x325   :  { %756 = vrot.lane.b32.xlu1 %v1981_v46, %s1282_s23 }
 0x329   :  { %754 = vrot.lane.b32.xlu1 %v1979_v44, %s1282_s23 }
 0x353   :  { %v857_v7 = vpop.permute.xlu0 %856  ;;  %v897_v47 = vpop.permute.xlu1 %896 }
 0x357   :  { %v901_v48 = vpop.permute.xlu0 %900  ;;  %v899_v49 = vpop.permute.xlu1 %898 }
 0x358   :  { %v903_v51 = vsel %vm2325_vm2, %v897_v47, %v899_v49  ;;  %v902_v60 = vsel %vm2324_vm1, %v899_v49, %v901_v48  ;;  %vm2329_vm2 = vcmp.le.s32.totalorder %v1492_v14, 14  ;;  %vm2335_vm1 = vcmp.le.s32.totalorder %v1556_v38, 14 }
 0x359   :  { %1224 = vmatprep.subr.msk.mxu0 %vm1896_vm8, %v903_v51  ;;  %vm2328_vm8 = vcmp.lt.s32.totalorder %v1470_v9, 112  ;;  %v914_v51 = vld [vmem:[%s2214_s4] sm:$0xff] }
 0x35b   :  { %v837_v52 = vpop.permute.xlu0 %836  ;;  %v895_v54 = vpop.permute.xlu1 %894 }
 0x35c   :  { %v904_v55 = vsel %vm2326_vm11, %v895_v54, %v897_v47  ;;  %v905_v58 = vsel %vm2327_vm3, %v901_v48, %v895_v54  ;;  %vm2333_vm11 = vcmp.le.s32.totalorder %v1494_v17, 14  ;;  %vm2334_vm3 = vcmp.le.s32.totalorder %v1550_v34, 14 }
 0x35d   :  { %1225 = vmatpush1.msk.msra.mxu0 %vm1904_vm6, %v904_v55  ;;  %1240 = vmatprep.subr.msk.mxu1 %vm1939_vm9, %v905_v58  ;;  %vm2330_vm6 = vmmov %vm2328_vm8 }
 0x35e   :  { %1241 = vmatpush1.msk.msra.mxu1 %vm1947_vm0, %v902_v60  ;;  %vm2331_vm9 = vmmov %vm2330_vm6 }
 0x35f   :  { %v881_v57 = vpop.permute.xlu0 %880  ;;  %v877_v10 = vpop.permute.xlu1 %876  ;;  %vm2332_vm0 = vmmov %vm2330_vm6 }
 0x363   :  { %v861_v12 = vpop.permute.xlu0 %860  ;;  %v879_v15 = vpop.permute.xlu1 %878 }
 0x364   :  { %v883_v16 = vsel %vm2328_vm8, %v877_v10, %v879_v15  ;;  %v882_v31 = vsel %vm2332_vm0, %v879_v15, %v881_v57  ;;  %vm2336_vm8 = vcmp.lt.s32.totalorder %v1470_v9, 113 }
 0x365   :  { %1226 = vmatprep.subr.msk.mxu0 %vm2329_vm2, %v883_v16  ;;  %vm2337_vm2 = vnez %v2249_v33 }
 0x367   :  { %v813_v19 = vpop.permute.xlu0 %812  ;;  %v875_v20 = vpop.permute.xlu1 %874 }
 0x368   :  { %v884_v8 = vsel %vm2330_vm6, %v875_v20, %v877_v10  ;;  %v885_v27 = vsel %vm2331_vm9, %v881_v57, %v875_v20  ;;  %vm2338_vm6 = vmmov %vm2336_vm8 }
 0x369   :  { %1227 = vmatpush1.msk.msra.mxu0 %vm2333_vm11, %v884_v8  ;;  %1242 = vmatprep.subr.msk.mxu1 %vm2334_vm3, %v885_v27  ;;  %vm2339_vm9 = vmmov %vm2338_vm6  ;;  %vm2341_vm11 = vnez %v2253_v40  ;;  %vm2342_vm3 = vnez %v2263_v63 }
 0x36a   :  { %1243 = vmatpush1.msk.msra.mxu1 %vm2335_vm1, %v882_v31  ;;  %vm2340_vm0 = vmmov %vm2338_vm6  ;;  %vm2343_vm1 = vnez %v2265_v11 }
 0x36b   :  { %v817_v21 = vpop.permute.xlu0 %816  ;;  %v859_v22 = vpop.permute.xlu1 %858 }
 0x36c   :  { %v863_v23 = vsel %vm2336_vm8, %v857_v7, %v859_v22  ;;  %v862_v32 = vsel %vm2340_vm0, %v859_v22, %v861_v12  ;;  %vm2344_vm8 = vcmp.lt.s32.totalorder %v1470_v9, 127 }
 0x36d   :  { %1228 = vmatprep.subr.msk.mxu0 %vm2337_vm2, %v863_v23  ;;  %vm2345_vm2 = vmmov %vm2344_vm8  ;;  %v1115_v23 = vld [vmem:[%s2215_s5] sm:$0xff] }
 0x36f   :  { %v793_v24 = vpop.permute.xlu0 %792  ;;  %v855_v26 = vpop.permute.xlu1 %854 }
 0x370   :  { %v864_v30 = vsel %vm2338_vm6, %v855_v26, %v857_v7  ;;  %v865_v0 = vsel %vm2339_vm9, %v861_v12, %v855_v26  ;;  %vm2346_vm6 = vcmp.lt.s32.totalorder %v1470_v9, 1 }
 0x371   :  { %1229 = vmatpush1.msk.msra.mxu0 %vm2341_vm11, %v864_v30  ;;  %1244 = vmatprep.subr.msk.mxu1 %vm2342_vm3, %v865_v0  ;;  %vm2347_vm9 = vmmov %vm2346_vm6  ;;  %vm2353_vm11 = vnez %v2271_v4  ;;  %v1119_v30 = vld [vmem:[%s2216_s6] sm:$0xff] }
 0x372   :  { %1245 = vmatpush1.msk.msra.mxu1 %vm2343_vm1, %v862_v32  ;;  %vm2357_vm1 = vnez %v2273_v45 }
 0x373   :  { %v839_v33 = vpop.permute.xlu1 %838  ;;  %v771_v3 = vpop.permute.xlu0 %770 }
 0x374   :  { %v843_v35 = vsel %vm2344_vm8, %v837_v52, %v839_v33  ;;  %vm2358_vm8 = vnez %v2279_v13 }
 0x375   :  { %1230 = vmatprep.subr.msk.mxu0 %vm1603_vm12, %v843_v35  ;;  %vm2348_vm12 = vmmov %vm2345_vm2 }
 0x377   :  { %v835_v36 = vpop.permute.xlu1 %834  ;;  %v815_v40 = vpop.permute.xlu0 %814 }
 0x378   :  { %v844_v42 = vsel %vm2345_vm2, %v835_v36, %v837_v52 }
 0x379   :  { %1231 = vmatpush1.msk.msra.mxu0 %vm1619_vm15, %v844_v42  ;;  %vm2349_vm15 = vmmov %vm2345_vm2  ;;  %vm2361_vm2 = vcmp.ge.s32.totalorder %v1492_v14, 1 }
 0x37a   :  { %977 = vmatprep.subr.mxu0 %v1973_v6 }
 0x37b   :  { %978 = vmatpush1.msra.mxu0 %v1987_v41  ;;  %v811_v63 = vpop.permute.xlu1 %810  ;;  %v751_v2 = vpop.permute.xlu0 %750 }
 0x37c   :  { %v820_v11 = vsel %vm2346_vm6, %v811_v63, %v813_v19  ;;  %v821_v56 = vsel %vm2347_vm9, %v817_v21, %v811_v63 }
 0x37d   :  { %1232 = vmatprep.subr.msk.mxu0 %vm1523_vm4, %v820_v11  ;;  %vm2350_vm4 = vmmov %vm2346_vm6 }
 0x37e   :  { %1233 = vmatpush1.msk.msra.mxu0 %vm1552_vm7, %v821_v56  ;;  %v818_v37 = vsel %vm2350_vm4, %v815_v40, %v817_v21  ;;  %vm2351_vm7 = vcmp.lt.s32.totalorder %v1470_v9, 15  ;;  %vm2352_vm0 = vmmov %vm2350_vm4  ;;  %vm2366_vm4 = vcmp.ge.s32.totalorder %v1550_v34, 1 }
 0x37f   :  { %v841_v62 = vpop.permute.xlu1 %840  ;;  %v819_v39 = vsel %vm2352_vm0, %v813_v19, %v815_v40  ;;  %v795_v25 = vpop.permute.xlu0 %794  ;;  %vm2368_vm0 = vcmp.lt.s32.totalorder %v1470_v9, 17 }
 0x380   :  { %v842_v6 = vsel %vm2348_vm12, %v839_v33, %v841_v62  ;;  %v845_v43 = vsel %vm2349_vm15, %v841_v62, %v835_v36  ;;  %vm2365_vm15 = vcmp.ge.s32.totalorder %v1494_v17, 1 }
 0x381   :  { %1246 = vmatprep.subr.msk.mxu1 %vm1668_vm10, %v845_v43  ;;  %v1273_v43 = vld [vmem:[%s2210_s0 + $0x8] sm:$0xff] }
 0x382   :  { %1247 = vmatpush1.msk.msra.mxu1 %vm1673_vm5, %v842_v6  ;;  %vm2354_vm5 = vmmov %vm2351_vm7 }
 0x383   :  { %1048 = vmatprep.subr.mxu1 %v1981_v46  ;;  %v791_v28 = vpop.permute.xlu1 %790  ;;  %vm2355_vm10 = vmmov %vm2354_vm5  ;;  %v775_v4 = vpop.permute.xlu0 %774 }
 0x384   :  { %v800_v41 = vsel %vm2351_vm7, %v791_v28, %v793_v24  ;;  %1049 = vmatpush1.msra.mxu1 %v1979_v44  ;;  %vm2356_vm3 = vmmov %vm2354_vm5  ;;  %vm2367_vm7 = vcmp.ge.s32.totalorder %v1556_v38, 1 }
 0x385   :  { %1234 = vmatprep.subr.msk.mxu0 %vm2353_vm11, %v800_v41  ;;  %1248 = vmatprep.subr.msk.mxu1 %vm1607_vm13, %v818_v37  ;;  %v799_v7 = vsel %vm2356_vm3, %v793_v24, %v795_v25  ;;  %vm2359_vm13 = vnez %v2281_v18  ;;  %vm2369_vm11 = vnez %v2292_v1  ;;  %vm2371_vm3 = vnez %v2294_v5  ;;  %v1274_v37 = vld [vmem:[%s2210_s0 + $0x10] sm:$0xff] }
 0x386   :  { %1249 = vmatpush1.msk.msra.mxu1 %vm1613_vm14, %v819_v39  ;;  %vm2360_vm14 = vcmp.lt.s32.totalorder %v1470_v9, 16  ;;  %v1275_v39 = vld [vmem:[%s2210_s0 + $0x18] sm:$0xff] }
 0x387   :  { %v797_v29 = vpop.permute.xlu1 %796  ;;  %vm2362_vm6 = vmmov %vm2360_vm14 }
 0x388   :  { %v798_v46 = vsel %vm2354_vm5, %v795_v25, %v797_v29  ;;  %v801_v44 = vsel %vm2355_vm10, %v797_v29, %v791_v28  ;;  %vm2363_vm9 = vmmov %vm2362_vm6  ;;  %vm951_vm5 = vcmask 588800  }
 0x389   :  { %1235 = vmatpush1.msk.msra.mxu0 %vm2357_vm1, %v801_v44  ;;  %1250 = vmatprep.subr.msk.mxu1 %vm2358_vm8, %v798_v46  ;;  %vm2364_vm12 = vmmov %vm2362_vm6 }
 0x38a   :  { %1251 = vmatpush1.msk.msra.mxu1 %vm2359_vm13, %v799_v7  ;;  %vm2370_vm10 = vmmov %vm2368_vm0  ;;  %vm2374_vm13 = vnez %v2301_v50 }
 0x38b   :  { %v773_v59 = vpop.permute.xlu1 %772  ;;  %vm2372_vm1 = vmmov %vm2368_vm0 }
 0x38c   :  { %v780_v61 = vsel %vm2360_vm14, %v771_v3, %v773_v59  ;;  %v779_v13 = vsel %vm2364_vm12, %v773_v59, %v775_v4  ;;  %vm2373_vm8 = vmmov %vm2368_vm0  ;;  %vm2375_vm14 = vnez %v2304_v53 }
 0x38d   :  { %1236 = vmatprep.subr.msk.mxu0 %vm2361_vm2, %v780_v61 }
 0x38f   :  { %v777_v47 = vpop.permute.xlu1 %776 }
 0x390   :  { %v778_v48 = vsel %vm2362_vm6, %v775_v4, %v777_v47  ;;  %v781_v45 = vsel %vm2363_vm9, %v777_v47, %v771_v3 }
 0x391   :  { %1237 = vmatpush1.msk.msra.mxu0 %vm2365_vm15, %v781_v45  ;;  %1252 = vmatprep.subr.msk.mxu1 %vm2366_vm4, %v778_v48 }
 0x392   :  { %1253 = vmatpush1.msk.msra.mxu1 %vm2367_vm7, %v779_v13 }
 0x393   :  { %v753_v14 = vpop.permute.xlu1 %752 }
 0x394   :  { %v760_v18 = vsel %vm2368_vm0, %v751_v2, %v753_v14 }
 0x395   :  { %1238 = vmatprep.subr.msk.mxu0 %vm2369_vm11, %v760_v18 }
 0x397   :  { %v757_v49 = vpop.permute.xlu1 %756 }
 0x398   :  { %v761_v17 = vsel %vm2370_vm10, %v757_v49, %v751_v2  ;;  %v1272_v2 = vld [vmem:[%s2210_s0] sm:$0xff] }
 0x399   :  { %1239 = vmatpush1.msk.msra.mxu0 %vm2371_vm3, %v761_v17 }
 0x39a   :  { %1158 = vmatmul.mubr.msk.f32.vlgmr.msra.gmra.mxu0 %vm951_vm5, %v914_v51 }
 0x39b   :  { %v755_v34 = vpop.permute.xlu1 %754 }
 0x39c   :  { %v758_v38 = vsel %vm2372_vm1, %v755_v34, %v757_v49  ;;  %v759_v1 = vsel %vm2373_vm8, %v753_v14, %v755_v34 }
 0x39d   :  { %1254 = vmatprep.subr.msk.mxu1 %vm2374_vm13, %v758_v38 }
 0x39e   :  { %1255 = vmatpush1.msk.msra.mxu1 %vm2375_vm14, %v759_v1 }
 0x39f   :  { %1159 = vmatmul.mubr.msk.f32.vlgmr.msra.gmra.mxu1 %vm951_vm5, %v914_v51 }
 0x45a   :  { %v1021_v52 = vpop.f32.mrf.mxu0 }
 0x45b   :  { %v1103_v54 = vmul.f32 %v1021_v52, %v1021_v52 }
 0x45c   :  { %v1023_v55 = vpop.f32.mrf.mxu0 }
 0x45d   :  { %v1097_v5 = vadd.f32 %v1023_v55, %v1021_v52  ;;  %v1104_v58 = vmul.f32 %v1023_v55, %v1023_v55 }
 0x45f   :  { %v1107_v60 = vadd.f32 %v1104_v58, %v1103_v54  ;;  %v1092_v57 = vpop.f32.mrf.mxu1 }
 0x460   :  { %v1105_v10 = vmul.f32 %v1092_v57, %v1092_v57  ;;  %v1098_v12 = vadd.f32 %v1097_v5, %v1092_v57 }
 0x461   :  { %v1094_v15 = vpop.f32.mrf.mxu1 }
 0x462   :  { %v1108_v16 = vadd.f32 %v1107_v60, %v1105_v10  ;;  %v1106_v9 = vmul.f32 %v1094_v15, %v1094_v15  ;;  %v1099_v19 = vadd.f32 %v1098_v12, %v1094_v15 }
 0x464   :  { %v1109_v20 = vadd.f32 %v1108_v16, %v1106_v9  ;;  %1100 = vadd.xlane.f32.xlu0 %v1099_v19 }
 0x466   :  { %1110 = vadd.xlane.f32.xlu1 %v1109_v20 }
 0x4ed   :  { %v1101_v50 = vpop.xlane.xlu0 %1100 }
 0x4ee   :  { %v1102_v53 = vmul.f32 0.001953125, %v1101_v50 }
 0x4ef   :  { %v1111_v8 = vpop.xlane.xlu1 %1110 }
 0x4f0   :  { %v1113_v27 = vmul.f32 %v1102_v53, %v1102_v53  ;;  %v1112_v31 = vmul.f32 0.001953125, %v1111_v8 }
 0x4f2   :  { %v1114_v21 = vsub.f32 %v1112_v31, %v1113_v27 }
 0x4f4   :  { %v1116_v22 = vadd.f32 1e-05, %v1114_v21 }
 0x4f6   :  { %1270 = vrsqrt.f32 %v1116_v22 }
 0x503   :  { %v1271_v24 = vpop.eup %1270 }
 0x504   :  { %v1118_v26 = vmul.f32 %v1271_v24, %v1115_v23 }
 0x506   :  { %1124 = vperm.xlu0 %1266, %v1118_v26   ;;  %v1120_v0 = vmul.f32 %v1118_v26, %v1102_v53 }
 0x508   :  { %v1121_v32 = vsub.f32 %v1119_v30, %v1120_v0 }
 0x50a   :  { %1133 = vperm.xlu1 %1267, %v1121_v32  }
 0x581   :  { %v1125_v33 = vpop.permute.xlu0 %1124 }
 0x582   :  { %v1127_v3 = vmul.f32 %v1125_v33, %v1021_v52  ;;  %v1128_v35 = vmul.f32 %v1125_v33, %v1023_v55  ;;  %v1129_v36 = vmul.f32 %v1125_v33, %v1092_v57  ;;  %v1130_v42 = vmul.f32 %v1125_v33, %v1094_v15 }
 0x585   :  { %v1134_v40 = vpop.permute.xlu1 %1133 }
 0x586   :  { %v1136_v63 = vadd.f32 %v1134_v40, %v1127_v3  ;;  %v1137_v11 = vadd.f32 %v1134_v40, %v1128_v35  ;;  %v1138_v56 = vadd.f32 %v1134_v40, %v1129_v36  ;;  %v1139_v62 = vadd.f32 %v1134_v40, %v1130_v42 }
 0x588   :  { %v1140_v6 = vadd.f32 %v1272_v2, %v1136_v63  ;;  %v1141_v28 = vadd.f32 %v1273_v43, %v1137_v11  ;;  %v1142_v41 = vadd.f32 %v1274_v37, %v1138_v56  ;;  %v1143_v25 = vadd.f32 %v1275_v39, %v1139_v62 }
 0x58a   :  { %v1144_v29 = vmax.f32 %v1140_v6, 0.0  ;;  %v1145_v46 = vmax.f32 %v1141_v28, 0.0  ;;  %v1146_v44 = vmax.f32 %v1142_v41, 0.0  ;;  %v1147_v7 = vmax.f32 %v1143_v25, 0.0 }
 0x58c   :  { %1148 = vst [vmem:[%s2217_s7] sm:$0xff] %v1144_v29  ;;  %1149 = vst [vmem:[%s2217_s7 + $0x8] sm:$0xff] %v1145_v46 }
 0x58d   :  { %1150 = vst [vmem:[%s2217_s7 + $0x10] sm:$0xff] %v1146_v44  ;;  %1151 = vst [vmem:[%s2217_s7 + $0x18] sm:$0xff] %v1147_v7 }

</bundles_post_ra>
